<compile_context>
chip_gen: v7x
topology: tpu7x:2x2x1
jax: 0.10.0
libtpu: 0.0.40
codegen_flags: <defaults>
</compile_context>

<pallas_src>
import numpy as np

import jax
import jax.numpy as jnp
from jax.experimental import pallas as pl
from jax.experimental.pallas import tpu as pltpu

HIDDEN_SIZES = [500, 400, 300, 200, 100, 50]
NEG_SLOPE = 0.01     # nn.LeakyReLU default
BN_EPS = 1e-5        # nn.BatchNorm1d default
LANE = 128


def _round_up(n, m):
    return (n + m - 1) // m * m


def _make_kernel(geom, n_real_out):
    """geom: tuple of (row_off, col_off, k, out_pad) per layer (static ints)."""
    n_layers = len(geom)

    def kernel(x_ref, w_hbm, b_ref, o_ref, wbuf, sem):
        # Manual double-buffered DMA of per-layer weight bands (HBM -> VMEM).
        def band_copy(i):
            roff, coff, k, op = geom[i]
            slot = i % 2
            return pltpu.make_async_copy(
                w_hbm.at[roff:roff + k, coff:coff + op],
                wbuf.at[slot, 0:k, 0:op],
                sem.at[slot])

        copies = [band_copy(i) for i in range(n_layers)]
        copies[0].start()                                   # prime layer 0

        h = x_ref[...]                                      # (B, input_size) f32
        for i, (roff, coff, k, op) in enumerate(geom):
            slot = i % 2
            if i + 1 < n_layers:
                copies[i + 1].start()                       # prefetch next band
            copies[i].wait()

            w = wbuf[slot, 0:k, 0:op]                       # bf16 (k, op)
            b = b_ref[i:i + 1, 0:op]                        # f32  (1, op)

            # Linear (bf16 MXU inputs, f32 accumulation)
            z = jnp.dot(h.astype(jnp.bfloat16), w,
                        preferred_element_type=jnp.float32) + b

            if i < n_layers - 1:
                # LeakyReLU (single max instead of compare+select)
                a = jnp.maximum(z, NEG_SLOPE * z)
                # BatchNorm1d, training mode, gamma=1 / beta=0 (fresh module).
                # Two-pass biased variance matches the PyTorch forward.
                mean = jnp.mean(a, axis=0, keepdims=True)
                var = jnp.mean((a - mean) * (a - mean), axis=0, keepdims=True)
                h = (a - mean) * jax.lax.rsqrt(var + BN_EPS)
            else:
                # Mask padded logit lanes, then numerically-stable softmax.
                col = jax.lax.broadcasted_iota(jnp.int32, z.shape, 1)
                z = jnp.where(col < n_real_out, z, -1e30)
                z = z - jnp.max(z, axis=-1, keepdims=True)
                e = jnp.exp(z)
                o_ref[...] = e / jnp.sum(e, axis=-1, keepdims=True)

    return kernel


def init_params(key, input_size, output_size):
    """Deterministic PyTorch-style Linear init: U(-1/sqrt(fan_in), +1/sqrt(fan_in)).

    BatchNorm1d affine params of a freshly constructed module are gamma=1 /
    beta=0 (identity) -- they are folded away, not materialized.
    """
    dims = [input_size] + HIDDEN_SIZES + [output_size]
    params = []
    for i in range(len(dims) - 1):
        fan_in, fan_out = dims[i], dims[i + 1]
        key, kw, kb = jax.random.split(key, 3)
        bound = 1.0 / float(fan_in) ** 0.5
        # weight stored already transposed to (in, out) so kernel does x @ w
        w = jax.random.uniform(kw, (fan_in, fan_out), jnp.float32, -bound, bound)
        b = jax.random.uniform(kb, (fan_out,), jnp.float32, -bound, bound)
        params.append((w, b))
    return params


def pack_params(params):
    """Pack per-layer (w, b) into one bf16 weight slab + one f32 bias slab.

    Narrow layers are column-packed into the zero holes left by wide layers
    (first-fit 2-D rectangle packing on a 128-aligned grid); e.g. the three
    last hidden/output bands exactly fill the 512x128 hole to the right of the
    (512, 384) band, cutting the slab from 2048 to 1536 rows.
    """
    in_dims = [w.shape[0] for w, _ in params]
    out_dims = [w.shape[1] for w, _ in params]
    in_pads = [_round_up(d, LANE) for d in in_dims]
    out_pads = [_round_up(d, LANE) for d in out_dims]
    for i in range(1, len(params)):
        assert in_pads[i] == out_pads[i - 1]   # activation width consistency
    slab_cols = max(out_pads)

    # --- first-fit placement into existing zero holes ------------------------
    holes = []        # (row, col, nrows, ncols), all 128-aligned
    placements = []   # (row, col) per layer
    total_rows = 0
    for ip, op in zip(in_pads, out_pads):
        placed = False
        for hi, (hr, hc, hnr, hnc) in enumerate(holes):
            if ip <= hnr and op <= hnc:
                placements.append((hr, hc))
                del holes[hi]
                if hnr - ip > 0:
                    holes.append((hr + ip, hc, hnr - ip, hnc))
                if hnc - op > 0:
                    holes.append((hr, hc + op, ip, hnc - op))
                placed = True
                break
        if not placed:
            placements.append((total_rows, 0))
            if slab_cols - op > 0:
                holes.append((total_rows, op, ip, slab_cols - op))
            total_rows += ip

    # --- build slabs; occupancy mask guards against any packer overlap bug ---
    occ = np.zeros((total_rows, slab_cols), dtype=bool)
    w_slab = jnp.zeros((total_rows, slab_cols), jnp.float32)
    b_slab = jnp.zeros((_round_up(len(params), 8), slab_cols), jnp.float32)
    geom = []
    for i, ((w, b), (r, c), ip, op) in enumerate(
            zip(params, placements, in_pads, out_pads)):
        fan_in, fan_out = w.shape
        assert not occ[r:r + ip, c:c + op].any(), "packed weight bands overlap"
        occ[r:r + ip, c:c + op] = True
        w_slab = w_slab.at[r:r + fan_in, c:c + fan_out].set(w)
        b_slab = b_slab.at[i, :fan_out].set(b)
        # Layer 0 streams only the real input rows (x is passed unpadded);
        # later layers consume the previous layer's padded activation width.
        k = fan_in if i == 0 else ip
        geom.append((r, c, k, op))

    w_slab = w_slab.astype(jnp.bfloat16)   # bf16 weights in HBM (half the bytes)
    return w_slab, b_slab, tuple(geom)


def image_classifier_forward(x, packed, output_size):
    w_slab, b_slab, geom = packed
    batch = x.shape[0]
    out_pad_last = geom[-1][3]
    max_k = max(g[2] for g in geom)
    max_op = max(g[3] for g in geom)

    flops = 2 * batch * sum(k * op for _, _, k, op in geom)
    transcendentals = sum(op for _, _, _, op in geom[:-1]) + batch * out_pad_last
    # bytes actually moved: per-layer weight bands (bf16) + biases + x + out
    bytes_accessed = (2 * sum(k * op for _, _, k, op in geom)
                      + b_slab.size * 4 + x.size * 4 + batch * out_pad_last * 4)

    out = pl.pallas_call(
        _make_kernel(geom, output_size),
        out_shape=jax.ShapeDtypeStruct((batch, out_pad_last), jnp.float32),
        in_specs=[
            pl.BlockSpec(memory_space=pltpu.MemorySpace.VMEM),   # x (unpadded)
            pl.BlockSpec(memory_space=pl.ANY),                   # weight slab (HBM)
            pl.BlockSpec(memory_space=pltpu.MemorySpace.VMEM),   # bias slab
        ],
        out_specs=pl.BlockSpec(memory_space=pltpu.MemorySpace.VMEM),
        scratch_shapes=[
            pltpu.VMEM((2, max_k, max_op), jnp.bfloat16),        # double buffer
            pltpu.SemaphoreType.DMA((2,)),
        ],
        cost_estimate=pl.CostEstimate(flops=flops,
                                      transcendentals=transcendentals,
                                      bytes_accessed=bytes_accessed),
    )(x, w_slab, b_slab)
    return out[:, :output_size]


def reference_forward(x, params):
    """Pure-JAX reference mirroring the PyTorch forward (training-mode BN).

    Weights/activations are rounded to bf16 before each matmul to mirror the
    kernel's MXU input precision (intentional precision choice); everything
    else (bias add, LeakyReLU, BN, softmax) is f32 as in the PyTorch module.
    """
    h = x
    n = len(params)
    for i, (w, b) in enumerate(params):
        z = jnp.dot(h.astype(jnp.bfloat16), w.astype(jnp.bfloat16),
                    preferred_element_type=jnp.float32) + b
        if i < n - 1:
            a = jnp.where(z >= 0, z, NEG_SLOPE * z)
            mean = jnp.mean(a, axis=0, keepdims=True)
            var = jnp.mean((a - mean) ** 2, axis=0, keepdims=True)
            h = (a - mean) / jnp.sqrt(var + BN_EPS)
        else:
            h = jax.nn.softmax(z, axis=-1)
    return h


if __name__ == "__main__":
    batch, input_size, output_size = 8, 64, 10

    key = jax.random.PRNGKey(0)
    key, kx = jax.random.split(key)
    x = jax.random.normal(kx, (batch, input_size), dtype=jnp.float32)
    params = init_params(key, input_size, output_size)
    packed = pack_params(params)

    out = image_classifier_forward(x, packed, output_size)
    out = jax.block_until_ready(out)

    ref = reference_forward(x, params)
    assert out.shape == (batch, output_size)
    assert jnp.allclose(jnp.sum(out, axis=-1), 1.0, atol=1e-5)
    # bf16 matmul inputs -> relaxed tolerance vs the f32-elementwise reference.
    assert jnp.allclose(out, ref, atol=5e-3, rtol=5e-3)

    print("KERNEL_OK")
</pallas_src>

<mosaic_0001>
module attributes {stable_mosaic.version = 11 : i64} {
  func.func @kernel(%arg0: memref<8x64xf32, #tpu.memory_space<vmem>>, %arg1: memref<1536x512xbf16, #tpu.memory_space<any>>, %arg2: memref<8x512xf32, #tpu.memory_space<vmem>>, %arg3: memref<8x128xf32, #tpu.memory_space<vmem>>, %arg4: memref<2x512x512xbf16, #tpu.memory_space<vmem>>, %arg5: memref<2x!tpu.dma_semaphore, #tpu.memory_space<semaphore_mem>>) attributes {dimension_semantics = [], scalar_prefetch = 0 : i64, scratch_operands = 2 : i64, tpu.core_type = #tpu.core_type<tc>} {
    %c0_i32 = arith.constant 0 : i32
    %c0_i32_0 = arith.constant 0 : i32
    %c0_i32_1 = arith.constant 0 : i32
    %c0_i32_2 = arith.constant 0 : i32
    %0 = tpu.memref_slice %arg1[%c0_i32_1, %c0_i32_2] : memref<1536x512xbf16, #tpu.memory_space<any>> -> memref<64x512xbf16, #tpu.memory_space<any>>
    %c0_i32_3 = arith.constant 0 : i32
    %c0_i32_4 = arith.constant 0 : i32
    %1 = tpu.memref_slice %arg4[%c0_i32, %c0_i32_3, %c0_i32_4] : memref<2x512x512xbf16, #tpu.memory_space<vmem>> -> memref<1x64x512xbf16, #tpu.memory_space<vmem>>
    %2 = tpu.memref_squeeze %1 : memref<1x64x512xbf16, #tpu.memory_space<vmem>> -> memref<64x512xbf16, #tpu.memory_space<vmem>>
    %3 = tpu.memref_slice %arg5[%c0_i32_0] : memref<2x!tpu.dma_semaphore, #tpu.memory_space<semaphore_mem>> -> memref<1x!tpu.dma_semaphore, #tpu.memory_space<semaphore_mem>>
    %4 = tpu.memref_squeeze %3 : memref<1x!tpu.dma_semaphore, #tpu.memory_space<semaphore_mem>> -> memref<!tpu.dma_semaphore, #tpu.memory_space<semaphore_mem>>
    tpu.enqueue_dma source(%0 : memref<64x512xbf16, #tpu.memory_space<any>>) target(%2 : memref<64x512xbf16, #tpu.memory_space<vmem>>) target_semaphore(%4 : memref<!tpu.dma_semaphore, #tpu.memory_space<semaphore_mem>>)
    %c0 = arith.constant 0 : index
    %c0_5 = arith.constant 0 : index
    %5 = vector.load %arg0[%c0, %c0_5] : memref<8x64xf32, #tpu.memory_space<vmem>>, vector<8x64xf32>
    %c1_i32 = arith.constant 1 : i32
    %c1_i32_6 = arith.constant 1 : i32
    %c128_i32 = arith.constant 128 : i32
    %c0_i32_7 = arith.constant 0 : i32
    %6 = tpu.memref_slice %arg1[%c128_i32, %c0_i32_7] : memref<1536x512xbf16, #tpu.memory_space<any>> -> memref<512x512xbf16, #tpu.memory_space<any>>
    %c0_i32_8 = arith.constant 0 : i32
    %c0_i32_9 = arith.constant 0 : i32
    %7 = tpu.memref_slice %arg4[%c1_i32, %c0_i32_8, %c0_i32_9] : memref<2x512x512xbf16, #tpu.memory_space<vmem>> -> memref<1x512x512xbf16, #tpu.memory_space<vmem>>
    %8 = tpu.memref_squeeze %7 : memref<1x512x512xbf16, #tpu.memory_space<vmem>> -> memref<512x512xbf16, #tpu.memory_space<vmem>>
    %9 = tpu.memref_slice %arg5[%c1_i32_6] : memref<2x!tpu.dma_semaphore, #tpu.memory_space<semaphore_mem>> -> memref<1x!tpu.dma_semaphore, #tpu.memory_space<semaphore_mem>>
    %10 = tpu.memref_squeeze %9 : memref<1x!tpu.dma_semaphore, #tpu.memory_space<semaphore_mem>> -> memref<!tpu.dma_semaphore, #tpu.memory_space<semaphore_mem>>
    tpu.enqueue_dma source(%6 : memref<512x512xbf16, #tpu.memory_space<any>>) target(%8 : memref<512x512xbf16, #tpu.memory_space<vmem>>) target_semaphore(%10 : memref<!tpu.dma_semaphore, #tpu.memory_space<semaphore_mem>>)
    %c0_i32_10 = arith.constant 0 : i32
    %c0_i32_11 = arith.constant 0 : i32
    %c0_i32_12 = arith.constant 0 : i32
    %c0_i32_13 = arith.constant 0 : i32
    %11 = tpu.memref_slice %arg1[%c0_i32_12, %c0_i32_13] : memref<1536x512xbf16, #tpu.memory_space<any>> -> memref<64x512xbf16, #tpu.memory_space<any>>
    %c0_i32_14 = arith.constant 0 : i32
    %c0_i32_15 = arith.constant 0 : i32
    %12 = tpu.memref_slice %arg4[%c0_i32_10, %c0_i32_14, %c0_i32_15] : memref<2x512x512xbf16, #tpu.memory_space<vmem>> -> memref<1x64x512xbf16, #tpu.memory_space<vmem>>
    %13 = tpu.memref_squeeze %12 : memref<1x64x512xbf16, #tpu.memory_space<vmem>> -> memref<64x512xbf16, #tpu.memory_space<vmem>>
    %14 = tpu.memref_slice %arg5[%c0_i32_11] : memref<2x!tpu.dma_semaphore, #tpu.memory_space<semaphore_mem>> -> memref<1x!tpu.dma_semaphore, #tpu.memory_space<semaphore_mem>>
    %15 = tpu.memref_squeeze %14 : memref<1x!tpu.dma_semaphore, #tpu.memory_space<semaphore_mem>> -> memref<!tpu.dma_semaphore, #tpu.memory_space<semaphore_mem>>
    tpu.wait_dma2 semaphore(%15 : memref<!tpu.dma_semaphore, #tpu.memory_space<semaphore_mem>>) src(%11 : memref<64x512xbf16, #tpu.memory_space<any>>) dst(%13 : memref<64x512xbf16, #tpu.memory_space<vmem>>)
    %c0_16 = arith.constant 0 : index
    %c0_17 = arith.constant 0 : index
    %c0_18 = arith.constant 0 : index
    %16 = vector.load %arg4[%c0_16, %c0_17, %c0_18] : memref<2x512x512xbf16, #tpu.memory_space<vmem>>, vector<1x64x512xbf16>
    %17 = vector.shape_cast %16 : vector<1x64x512xbf16> to vector<64x512xbf16>
    %c0_19 = arith.constant 0 : index
    %c0_20 = arith.constant 0 : index
    %18 = vector.load %arg2[%c0_19, %c0_20] : memref<8x512xf32, #tpu.memory_space<vmem>>, vector<1x512xf32>
    %19 = arith.truncf %5 : vector<8x64xf32> to vector<8x64xbf16>
    %cst = arith.constant dense<0.000000e+00> : vector<8x512xf32>
    %20 = tpu.matmul %19, %17, %cst {dimension_numbers = #tpu.dot_dimension_numbers<[1], [0], [0], [1], [0, 0, 1, 1], [], []>} : vector<8x64xbf16>, vector<64x512xbf16>, vector<8x512xf32> -> vector<8x512xf32>
    %21 = vector.broadcast %18 : vector<1x512xf32> to vector<8x512xf32>
    %22 = arith.addf %20, %21 : vector<8x512xf32>
    %cst_21 = arith.constant 0.00999999977 : f32
    %23 = vector.broadcast %cst_21 : f32 to vector<8x512xf32>
    %24 = arith.mulf %23, %22 : vector<8x512xf32>
    %25 = arith.maximumf %22, %24 : vector<8x512xf32>
    %cst_22 = arith.constant dense<0.000000e+00> : vector<512xf32>
    %26 = vector.multi_reduction <add>, %25, %cst_22 [0] : vector<8x512xf32> to vector<512xf32>
    %27 = vector.shape_cast %26 : vector<512xf32> to vector<1x512xf32>
    %cst_23 = arith.constant 8.000000e+00 : f32
    %28 = vector.broadcast %cst_23 : f32 to vector<1x512xf32>
    %29 = arith.divf %27, %28 : vector<1x512xf32>
    %30 = vector.broadcast %29 : vector<1x512xf32> to vector<8x512xf32>
    %31 = arith.subf %25, %30 : vector<8x512xf32>
    %32 = vector.broadcast %29 : vector<1x512xf32> to vector<8x512xf32>
    %33 = arith.subf %25, %32 : vector<8x512xf32>
    %34 = arith.mulf %31, %33 : vector<8x512xf32>
    %cst_24 = arith.constant dense<0.000000e+00> : vector<512xf32>
    %35 = vector.multi_reduction <add>, %34, %cst_24 [0] : vector<8x512xf32> to vector<512xf32>
    %36 = vector.shape_cast %35 : vector<512xf32> to vector<1x512xf32>
    %cst_25 = arith.constant 8.000000e+00 : f32
    %37 = vector.broadcast %cst_25 : f32 to vector<1x512xf32>
    %38 = arith.divf %36, %37 : vector<1x512xf32>
    %39 = vector.broadcast %29 : vector<1x512xf32> to vector<8x512xf32>
    %40 = arith.subf %25, %39 : vector<8x512xf32>
    %cst_26 = arith.constant 9.99999974E-6 : f32
    %41 = vector.broadcast %cst_26 : f32 to vector<1x512xf32>
    %42 = arith.addf %38, %41 : vector<1x512xf32>
    %43 = math.rsqrt %42 : vector<1x512xf32>
    %44 = vector.broadcast %43 : vector<1x512xf32> to vector<8x512xf32>
    %45 = arith.mulf %40, %44 : vector<8x512xf32>
    %c0_i32_27 = arith.constant 0 : i32
    %c0_i32_28 = arith.constant 0 : i32
    %c640_i32 = arith.constant 640 : i32
    %c0_i32_29 = arith.constant 0 : i32
    %46 = tpu.memref_slice %arg1[%c640_i32, %c0_i32_29] : memref<1536x512xbf16, #tpu.memory_space<any>> -> memref<512x384xbf16, #tpu.memory_space<any>>
    %c0_i32_30 = arith.constant 0 : i32
    %c0_i32_31 = arith.constant 0 : i32
    %47 = tpu.memref_slice %arg4[%c0_i32_27, %c0_i32_30, %c0_i32_31] : memref<2x512x512xbf16, #tpu.memory_space<vmem>> -> memref<1x512x384xbf16, #tpu.memory_space<vmem>>
    %48 = tpu.memref_squeeze %47 : memref<1x512x384xbf16, #tpu.memory_space<vmem>> -> memref<512x384xbf16, #tpu.memory_space<vmem>>
    %49 = tpu.memref_slice %arg5[%c0_i32_28] : memref<2x!tpu.dma_semaphore, #tpu.memory_space<semaphore_mem>> -> memref<1x!tpu.dma_semaphore, #tpu.memory_space<semaphore_mem>>
    %50 = tpu.memref_squeeze %49 : memref<1x!tpu.dma_semaphore, #tpu.memory_space<semaphore_mem>> -> memref<!tpu.dma_semaphore, #tpu.memory_space<semaphore_mem>>
    tpu.enqueue_dma source(%46 : memref<512x384xbf16, #tpu.memory_space<any>>) target(%48 : memref<512x384xbf16, #tpu.memory_space<vmem>>) target_semaphore(%50 : memref<!tpu.dma_semaphore, #tpu.memory_space<semaphore_mem>>)
    %c1_i32_32 = arith.constant 1 : i32
    %c1_i32_33 = arith.constant 1 : i32
    %c128_i32_34 = arith.constant 128 : i32
    %c0_i32_35 = arith.constant 0 : i32
    %51 = tpu.memref_slice %arg1[%c128_i32_34, %c0_i32_35] : memref<1536x512xbf16, #tpu.memory_space<any>> -> memref<512x512xbf16, #tpu.memory_space<any>>
    %c0_i32_36 = arith.constant 0 : i32
    %c0_i32_37 = arith.constant 0 : i32
    %52 = tpu.memref_slice %arg4[%c1_i32_32, %c0_i32_36, %c0_i32_37] : memref<2x512x512xbf16, #tpu.memory_space<vmem>> -> memref<1x512x512xbf16, #tpu.memory_space<vmem>>
    %53 = tpu.memref_squeeze %52 : memref<1x512x512xbf16, #tpu.memory_space<vmem>> -> memref<512x512xbf16, #tpu.memory_space<vmem>>
    %54 = tpu.memref_slice %arg5[%c1_i32_33] : memref<2x!tpu.dma_semaphore, #tpu.memory_space<semaphore_mem>> -> memref<1x!tpu.dma_semaphore, #tpu.memory_space<semaphore_mem>>
    %55 = tpu.memref_squeeze %54 : memref<1x!tpu.dma_semaphore, #tpu.memory_space<semaphore_mem>> -> memref<!tpu.dma_semaphore, #tpu.memory_space<semaphore_mem>>
    tpu.wait_dma2 semaphore(%55 : memref<!tpu.dma_semaphore, #tpu.memory_space<semaphore_mem>>) src(%51 : memref<512x512xbf16, #tpu.memory_space<any>>) dst(%53 : memref<512x512xbf16, #tpu.memory_space<vmem>>)
    %c1 = arith.constant 1 : index
    %c0_38 = arith.constant 0 : index
    %c0_39 = arith.constant 0 : index
    %56 = vector.load %arg4[%c1, %c0_38, %c0_39] : memref<2x512x512xbf16, #tpu.memory_space<vmem>>, vector<1x512x512xbf16>
    %57 = vector.shape_cast %56 : vector<1x512x512xbf16> to vector<512x512xbf16>
    %c1_40 = arith.constant 1 : index
    %c0_41 = arith.constant 0 : index
    %58 = vector.load %arg2[%c1_40, %c0_41] : memref<8x512xf32, #tpu.memory_space<vmem>>, vector<1x512xf32>
    %59 = arith.truncf %45 : vector<8x512xf32> to vector<8x512xbf16>
    %cst_42 = arith.constant dense<0.000000e+00> : vector<8x512xf32>
    %60 = tpu.matmul %59, %57, %cst_42 {dimension_numbers = #tpu.dot_dimension_numbers<[1], [0], [0], [1], [0, 0, 1, 1], [], []>} : vector<8x512xbf16>, vector<512x512xbf16>, vector<8x512xf32> -> vector<8x512xf32>
    %61 = vector.broadcast %58 : vector<1x512xf32> to vector<8x512xf32>
    %62 = arith.addf %60, %61 : vector<8x512xf32>
    %cst_43 = arith.constant 0.00999999977 : f32
    %63 = vector.broadcast %cst_43 : f32 to vector<8x512xf32>
    %64 = arith.mulf %63, %62 : vector<8x512xf32>
    %65 = arith.maximumf %62, %64 : vector<8x512xf32>
    %cst_44 = arith.constant dense<0.000000e+00> : vector<512xf32>
    %66 = vector.multi_reduction <add>, %65, %cst_44 [0] : vector<8x512xf32> to vector<512xf32>
    %67 = vector.shape_cast %66 : vector<512xf32> to vector<1x512xf32>
    %cst_45 = arith.constant 8.000000e+00 : f32
    %68 = vector.broadcast %cst_45 : f32 to vector<1x512xf32>
    %69 = arith.divf %67, %68 : vector<1x512xf32>
    %70 = vector.broadcast %69 : vector<1x512xf32> to vector<8x512xf32>
    %71 = arith.subf %65, %70 : vector<8x512xf32>
    %72 = vector.broadcast %69 : vector<1x512xf32> to vector<8x512xf32>
    %73 = arith.subf %65, %72 : vector<8x512xf32>
    %74 = arith.mulf %71, %73 : vector<8x512xf32>
    %cst_46 = arith.constant dense<0.000000e+00> : vector<512xf32>
    %75 = vector.multi_reduction <add>, %74, %cst_46 [0] : vector<8x512xf32> to vector<512xf32>
    %76 = vector.shape_cast %75 : vector<512xf32> to vector<1x512xf32>
    %cst_47 = arith.constant 8.000000e+00 : f32
    %77 = vector.broadcast %cst_47 : f32 to vector<1x512xf32>
    %78 = arith.divf %76, %77 : vector<1x512xf32>
    %79 = vector.broadcast %69 : vector<1x512xf32> to vector<8x512xf32>
    %80 = arith.subf %65, %79 : vector<8x512xf32>
    %cst_48 = arith.constant 9.99999974E-6 : f32
    %81 = vector.broadcast %cst_48 : f32 to vector<1x512xf32>
    %82 = arith.addf %78, %81 : vector<1x512xf32>
    %83 = math.rsqrt %82 : vector<1x512xf32>
    %84 = vector.broadcast %83 : vector<1x512xf32> to vector<8x512xf32>
    %85 = arith.mulf %80, %84 : vector<8x512xf32>
    %c1_i32_49 = arith.constant 1 : i32
    %c1_i32_50 = arith.constant 1 : i32
    %c1152_i32 = arith.constant 1152 : i32
    %c0_i32_51 = arith.constant 0 : i32
    %86 = tpu.memref_slice %arg1[%c1152_i32, %c0_i32_51] : memref<1536x512xbf16, #tpu.memory_space<any>> -> memref<384x256xbf16, #tpu.memory_space<any>>
    %c0_i32_52 = arith.constant 0 : i32
    %c0_i32_53 = arith.constant 0 : i32
    %87 = tpu.memref_slice %arg4[%c1_i32_49, %c0_i32_52, %c0_i32_53] : memref<2x512x512xbf16, #tpu.memory_space<vmem>> -> memref<1x384x256xbf16, #tpu.memory_space<vmem>>
    %88 = tpu.memref_squeeze %87 : memref<1x384x256xbf16, #tpu.memory_space<vmem>> -> memref<384x256xbf16, #tpu.memory_space<vmem>>
    %89 = tpu.memref_slice %arg5[%c1_i32_50] : memref<2x!tpu.dma_semaphore, #tpu.memory_space<semaphore_mem>> -> memref<1x!tpu.dma_semaphore, #tpu.memory_space<semaphore_mem>>
    %90 = tpu.memref_squeeze %89 : memref<1x!tpu.dma_semaphore, #tpu.memory_space<semaphore_mem>> -> memref<!tpu.dma_semaphore, #tpu.memory_space<semaphore_mem>>
    tpu.enqueue_dma source(%86 : memref<384x256xbf16, #tpu.memory_space<any>>) target(%88 : memref<384x256xbf16, #tpu.memory_space<vmem>>) target_semaphore(%90 : memref<!tpu.dma_semaphore, #tpu.memory_space<semaphore_mem>>)
    %c0_i32_54 = arith.constant 0 : i32
    %c0_i32_55 = arith.constant 0 : i32
    %c640_i32_56 = arith.constant 640 : i32
    %c0_i32_57 = arith.constant 0 : i32
    %91 = tpu.memref_slice %arg1[%c640_i32_56, %c0_i32_57] : memref<1536x512xbf16, #tpu.memory_space<any>> -> memref<512x384xbf16, #tpu.memory_space<any>>
    %c0_i32_58 = arith.constant 0 : i32
    %c0_i32_59 = arith.constant 0 : i32
    %92 = tpu.memref_slice %arg4[%c0_i32_54, %c0_i32_58, %c0_i32_59] : memref<2x512x512xbf16, #tpu.memory_space<vmem>> -> memref<1x512x384xbf16, #tpu.memory_space<vmem>>
    %93 = tpu.memref_squeeze %92 : memref<1x512x384xbf16, #tpu.memory_space<vmem>> -> memref<512x384xbf16, #tpu.memory_space<vmem>>
    %94 = tpu.memref_slice %arg5[%c0_i32_55] : memref<2x!tpu.dma_semaphore, #tpu.memory_space<semaphore_mem>> -> memref<1x!tpu.dma_semaphore, #tpu.memory_space<semaphore_mem>>
    %95 = tpu.memref_squeeze %94 : memref<1x!tpu.dma_semaphore, #tpu.memory_space<semaphore_mem>> -> memref<!tpu.dma_semaphore, #tpu.memory_space<semaphore_mem>>
    tpu.wait_dma2 semaphore(%95 : memref<!tpu.dma_semaphore, #tpu.memory_space<semaphore_mem>>) src(%91 : memref<512x384xbf16, #tpu.memory_space<any>>) dst(%93 : memref<512x384xbf16, #tpu.memory_space<vmem>>)
    %c0_60 = arith.constant 0 : index
    %c0_61 = arith.constant 0 : index
    %c0_62 = arith.constant 0 : index
    %96 = vector.load %arg4[%c0_60, %c0_61, %c0_62] : memref<2x512x512xbf16, #tpu.memory_space<vmem>>, vector<1x512x384xbf16>
    %97 = vector.shape_cast %96 : vector<1x512x384xbf16> to vector<512x384xbf16>
    %c2 = arith.constant 2 : index
    %c0_63 = arith.constant 0 : index
    %98 = vector.load %arg2[%c2, %c0_63] : memref<8x512xf32, #tpu.memory_space<vmem>>, vector<1x384xf32>
    %99 = arith.truncf %85 : vector<8x512xf32> to vector<8x512xbf16>
    %cst_64 = arith.constant dense<0.000000e+00> : vector<8x384xf32>
    %100 = tpu.matmul %99, %97, %cst_64 {dimension_numbers = #tpu.dot_dimension_numbers<[1], [0], [0], [1], [0, 0, 1, 1], [], []>} : vector<8x512xbf16>, vector<512x384xbf16>, vector<8x384xf32> -> vector<8x384xf32>
    %101 = vector.broadcast %98 : vector<1x384xf32> to vector<8x384xf32>
    %102 = arith.addf %100, %101 : vector<8x384xf32>
    %cst_65 = arith.constant 0.00999999977 : f32
    %103 = vector.broadcast %cst_65 : f32 to vector<8x384xf32>
    %104 = arith.mulf %103, %102 : vector<8x384xf32>
    %105 = arith.maximumf %102, %104 : vector<8x384xf32>
    %cst_66 = arith.constant dense<0.000000e+00> : vector<384xf32>
    %106 = vector.multi_reduction <add>, %105, %cst_66 [0] : vector<8x384xf32> to vector<384xf32>
    %107 = vector.shape_cast %106 : vector<384xf32> to vector<1x384xf32>
    %cst_67 = arith.constant 8.000000e+00 : f32
    %108 = vector.broadcast %cst_67 : f32 to vector<1x384xf32>
    %109 = arith.divf %107, %108 : vector<1x384xf32>
    %110 = vector.broadcast %109 : vector<1x384xf32> to vector<8x384xf32>
    %111 = arith.subf %105, %110 : vector<8x384xf32>
    %112 = vector.broadcast %109 : vector<1x384xf32> to vector<8x384xf32>
    %113 = arith.subf %105, %112 : vector<8x384xf32>
    %114 = arith.mulf %111, %113 : vector<8x384xf32>
    %cst_68 = arith.constant dense<0.000000e+00> : vector<384xf32>
    %115 = vector.multi_reduction <add>, %114, %cst_68 [0] : vector<8x384xf32> to vector<384xf32>
    %116 = vector.shape_cast %115 : vector<384xf32> to vector<1x384xf32>
    %cst_69 = arith.constant 8.000000e+00 : f32
    %117 = vector.broadcast %cst_69 : f32 to vector<1x384xf32>
    %118 = arith.divf %116, %117 : vector<1x384xf32>
    %119 = vector.broadcast %109 : vector<1x384xf32> to vector<8x384xf32>
    %120 = arith.subf %105, %119 : vector<8x384xf32>
    %cst_70 = arith.constant 9.99999974E-6 : f32
    %121 = vector.broadcast %cst_70 : f32 to vector<1x384xf32>
    %122 = arith.addf %118, %121 : vector<1x384xf32>
    %123 = math.rsqrt %122 : vector<1x384xf32>
    %124 = vector.broadcast %123 : vector<1x384xf32> to vector<8x384xf32>
    %125 = arith.mulf %120, %124 : vector<8x384xf32>
    %c0_i32_71 = arith.constant 0 : i32
    %c0_i32_72 = arith.constant 0 : i32
    %c640_i32_73 = arith.constant 640 : i32
    %c384_i32 = arith.constant 384 : i32
    %126 = tpu.memref_slice %arg1[%c640_i32_73, %c384_i32] : memref<1536x512xbf16, #tpu.memory_space<any>> -> memref<256x128xbf16, #tpu.memory_space<any>>
    %c0_i32_74 = arith.constant 0 : i32
    %c0_i32_75 = arith.constant 0 : i32
    %127 = tpu.memref_slice %arg4[%c0_i32_71, %c0_i32_74, %c0_i32_75] : memref<2x512x512xbf16, #tpu.memory_space<vmem>> -> memref<1x256x128xbf16, #tpu.memory_space<vmem>>
    %128 = tpu.memref_squeeze %127 : memref<1x256x128xbf16, #tpu.memory_space<vmem>> -> memref<256x128xbf16, #tpu.memory_space<vmem>>
    %129 = tpu.memref_slice %arg5[%c0_i32_72] : memref<2x!tpu.dma_semaphore, #tpu.memory_space<semaphore_mem>> -> memref<1x!tpu.dma_semaphore, #tpu.memory_space<semaphore_mem>>
    %130 = tpu.memref_squeeze %129 : memref<1x!tpu.dma_semaphore, #tpu.memory_space<semaphore_mem>> -> memref<!tpu.dma_semaphore, #tpu.memory_space<semaphore_mem>>
    tpu.enqueue_dma source(%126 : memref<256x128xbf16, #tpu.memory_space<any>>) target(%128 : memref<256x128xbf16, #tpu.memory_space<vmem>>) target_semaphore(%130 : memref<!tpu.dma_semaphore, #tpu.memory_space<semaphore_mem>>)
    %c1_i32_76 = arith.constant 1 : i32
    %c1_i32_77 = arith.constant 1 : i32
    %c1152_i32_78 = arith.constant 1152 : i32
    %c0_i32_79 = arith.constant 0 : i32
    %131 = tpu.memref_slice %arg1[%c1152_i32_78, %c0_i32_79] : memref<1536x512xbf16, #tpu.memory_space<any>> -> memref<384x256xbf16, #tpu.memory_space<any>>
    %c0_i32_80 = arith.constant 0 : i32
    %c0_i32_81 = arith.constant 0 : i32
    %132 = tpu.memref_slice %arg4[%c1_i32_76, %c0_i32_80, %c0_i32_81] : memref<2x512x512xbf16, #tpu.memory_space<vmem>> -> memref<1x384x256xbf16, #tpu.memory_space<vmem>>
    %133 = tpu.memref_squeeze %132 : memref<1x384x256xbf16, #tpu.memory_space<vmem>> -> memref<384x256xbf16, #tpu.memory_space<vmem>>
    %134 = tpu.memref_slice %arg5[%c1_i32_77] : memref<2x!tpu.dma_semaphore, #tpu.memory_space<semaphore_mem>> -> memref<1x!tpu.dma_semaphore, #tpu.memory_space<semaphore_mem>>
    %135 = tpu.memref_squeeze %134 : memref<1x!tpu.dma_semaphore, #tpu.memory_space<semaphore_mem>> -> memref<!tpu.dma_semaphore, #tpu.memory_space<semaphore_mem>>
    tpu.wait_dma2 semaphore(%135 : memref<!tpu.dma_semaphore, #tpu.memory_space<semaphore_mem>>) src(%131 : memref<384x256xbf16, #tpu.memory_space<any>>) dst(%133 : memref<384x256xbf16, #tpu.memory_space<vmem>>)
    %c1_82 = arith.constant 1 : index
    %c0_83 = arith.constant 0 : index
    %c0_84 = arith.constant 0 : index
    %136 = vector.load %arg4[%c1_82, %c0_83, %c0_84] : memref<2x512x512xbf16, #tpu.memory_space<vmem>>, vector<1x384x256xbf16>
    %137 = vector.shape_cast %136 : vector<1x384x256xbf16> to vector<384x256xbf16>
    %c3 = arith.constant 3 : index
    %c0_85 = arith.constant 0 : index
    %138 = vector.load %arg2[%c3, %c0_85] : memref<8x512xf32, #tpu.memory_space<vmem>>, vector<1x256xf32>
    %139 = arith.truncf %125 : vector<8x384xf32> to vector<8x384xbf16>
    %cst_86 = arith.constant dense<0.000000e+00> : vector<8x256xf32>
    %140 = tpu.matmul %139, %137, %cst_86 {dimension_numbers = #tpu.dot_dimension_numbers<[1], [0], [0], [1], [0, 0, 1, 1], [], []>} : vector<8x384xbf16>, vector<384x256xbf16>, vector<8x256xf32> -> vector<8x256xf32>
    %141 = vector.broadcast %138 : vector<1x256xf32> to vector<8x256xf32>
    %142 = arith.addf %140, %141 : vector<8x256xf32>
    %cst_87 = arith.constant 0.00999999977 : f32
    %143 = vector.broadcast %cst_87 : f32 to vector<8x256xf32>
    %144 = arith.mulf %143, %142 : vector<8x256xf32>
    %145 = arith.maximumf %142, %144 : vector<8x256xf32>
    %cst_88 = arith.constant dense<0.000000e+00> : vector<256xf32>
    %146 = vector.multi_reduction <add>, %145, %cst_88 [0] : vector<8x256xf32> to vector<256xf32>
    %147 = vector.shape_cast %146 : vector<256xf32> to vector<1x256xf32>
    %cst_89 = arith.constant 8.000000e+00 : f32
    %148 = vector.broadcast %cst_89 : f32 to vector<1x256xf32>
    %149 = arith.divf %147, %148 : vector<1x256xf32>
    %150 = vector.broadcast %149 : vector<1x256xf32> to vector<8x256xf32>
    %151 = arith.subf %145, %150 : vector<8x256xf32>
    %152 = vector.broadcast %149 : vector<1x256xf32> to vector<8x256xf32>
    %153 = arith.subf %145, %152 : vector<8x256xf32>
    %154 = arith.mulf %151, %153 : vector<8x256xf32>
    %cst_90 = arith.constant dense<0.000000e+00> : vector<256xf32>
    %155 = vector.multi_reduction <add>, %154, %cst_90 [0] : vector<8x256xf32> to vector<256xf32>
    %156 = vector.shape_cast %155 : vector<256xf32> to vector<1x256xf32>
    %cst_91 = arith.constant 8.000000e+00 : f32
    %157 = vector.broadcast %cst_91 : f32 to vector<1x256xf32>
    %158 = arith.divf %156, %157 : vector<1x256xf32>
    %159 = vector.broadcast %149 : vector<1x256xf32> to vector<8x256xf32>
    %160 = arith.subf %145, %159 : vector<8x256xf32>
    %cst_92 = arith.constant 9.99999974E-6 : f32
    %161 = vector.broadcast %cst_92 : f32 to vector<1x256xf32>
    %162 = arith.addf %158, %161 : vector<1x256xf32>
    %163 = math.rsqrt %162 : vector<1x256xf32>
    %164 = vector.broadcast %163 : vector<1x256xf32> to vector<8x256xf32>
    %165 = arith.mulf %160, %164 : vector<8x256xf32>
    %c1_i32_93 = arith.constant 1 : i32
    %c1_i32_94 = arith.constant 1 : i32
    %c1152_i32_95 = arith.constant 1152 : i32
    %c256_i32 = arith.constant 256 : i32
    %166 = tpu.memref_slice %arg1[%c1152_i32_95, %c256_i32] : memref<1536x512xbf16, #tpu.memory_space<any>> -> memref<128x128xbf16, #tpu.memory_space<any>>
    %c0_i32_96 = arith.constant 0 : i32
    %c0_i32_97 = arith.constant 0 : i32
    %167 = tpu.memref_slice %arg4[%c1_i32_93, %c0_i32_96, %c0_i32_97] : memref<2x512x512xbf16, #tpu.memory_space<vmem>> -> memref<1x128x128xbf16, #tpu.memory_space<vmem>>
    %168 = tpu.memref_squeeze %167 : memref<1x128x128xbf16, #tpu.memory_space<vmem>> -> memref<128x128xbf16, #tpu.memory_space<vmem>>
    %169 = tpu.memref_slice %arg5[%c1_i32_94] : memref<2x!tpu.dma_semaphore, #tpu.memory_space<semaphore_mem>> -> memref<1x!tpu.dma_semaphore, #tpu.memory_space<semaphore_mem>>
    %170 = tpu.memref_squeeze %169 : memref<1x!tpu.dma_semaphore, #tpu.memory_space<semaphore_mem>> -> memref<!tpu.dma_semaphore, #tpu.memory_space<semaphore_mem>>
    tpu.enqueue_dma source(%166 : memref<128x128xbf16, #tpu.memory_space<any>>) target(%168 : memref<128x128xbf16, #tpu.memory_space<vmem>>) target_semaphore(%170 : memref<!tpu.dma_semaphore, #tpu.memory_space<semaphore_mem>>)
    %c0_i32_98 = arith.constant 0 : i32
    %c0_i32_99 = arith.constant 0 : i32
    %c640_i32_100 = arith.constant 640 : i32
    %c384_i32_101 = arith.constant 384 : i32
    %171 = tpu.memref_slice %arg1[%c640_i32_100, %c384_i32_101] : memref<1536x512xbf16, #tpu.memory_space<any>> -> memref<256x128xbf16, #tpu.memory_space<any>>
    %c0_i32_102 = arith.constant 0 : i32
    %c0_i32_103 = arith.constant 0 : i32
    %172 = tpu.memref_slice %arg4[%c0_i32_98, %c0_i32_102, %c0_i32_103] : memref<2x512x512xbf16, #tpu.memory_space<vmem>> -> memref<1x256x128xbf16, #tpu.memory_space<vmem>>
    %173 = tpu.memref_squeeze %172 : memref<1x256x128xbf16, #tpu.memory_space<vmem>> -> memref<256x128xbf16, #tpu.memory_space<vmem>>
    %174 = tpu.memref_slice %arg5[%c0_i32_99] : memref<2x!tpu.dma_semaphore, #tpu.memory_space<semaphore_mem>> -> memref<1x!tpu.dma_semaphore, #tpu.memory_space<semaphore_mem>>
    %175 = tpu.memref_squeeze %174 : memref<1x!tpu.dma_semaphore, #tpu.memory_space<semaphore_mem>> -> memref<!tpu.dma_semaphore, #tpu.memory_space<semaphore_mem>>
    tpu.wait_dma2 semaphore(%175 : memref<!tpu.dma_semaphore, #tpu.memory_space<semaphore_mem>>) src(%171 : memref<256x128xbf16, #tpu.memory_space<any>>) dst(%173 : memref<256x128xbf16, #tpu.memory_space<vmem>>)
    %c0_104 = arith.constant 0 : index
    %c0_105 = arith.constant 0 : index
    %c0_106 = arith.constant 0 : index
    %176 = vector.load %arg4[%c0_104, %c0_105, %c0_106] : memref<2x512x512xbf16, #tpu.memory_space<vmem>>, vector<1x256x128xbf16>
    %177 = vector.shape_cast %176 : vector<1x256x128xbf16> to vector<256x128xbf16>
    %c4 = arith.constant 4 : index
    %c0_107 = arith.constant 0 : index
    %178 = vector.load %arg2[%c4, %c0_107] : memref<8x512xf32, #tpu.memory_space<vmem>>, vector<1x128xf32>
    %179 = arith.truncf %165 : vector<8x256xf32> to vector<8x256xbf16>
    %cst_108 = arith.constant dense<0.000000e+00> : vector<8x128xf32>
    %180 = tpu.matmul %179, %177, %cst_108 {dimension_numbers = #tpu.dot_dimension_numbers<[1], [0], [0], [1], [0, 0, 1, 1], [], []>} : vector<8x256xbf16>, vector<256x128xbf16>, vector<8x128xf32> -> vector<8x128xf32>
    %181 = vector.broadcast %178 : vector<1x128xf32> to vector<8x128xf32>
    %182 = arith.addf %180, %181 : vector<8x128xf32>
    %cst_109 = arith.constant 0.00999999977 : f32
    %183 = vector.broadcast %cst_109 : f32 to vector<8x128xf32>
    %184 = arith.mulf %183, %182 : vector<8x128xf32>
    %185 = arith.maximumf %182, %184 : vector<8x128xf32>
    %cst_110 = arith.constant dense<0.000000e+00> : vector<128xf32>
    %186 = vector.multi_reduction <add>, %185, %cst_110 [0] : vector<8x128xf32> to vector<128xf32>
    %187 = vector.shape_cast %186 : vector<128xf32> to vector<1x128xf32>
    %cst_111 = arith.constant 8.000000e+00 : f32
    %188 = vector.broadcast %cst_111 : f32 to vector<1x128xf32>
    %189 = arith.divf %187, %188 : vector<1x128xf32>
    %190 = vector.broadcast %189 : vector<1x128xf32> to vector<8x128xf32>
    %191 = arith.subf %185, %190 : vector<8x128xf32>
    %192 = vector.broadcast %189 : vector<1x128xf32> to vector<8x128xf32>
    %193 = arith.subf %185, %192 : vector<8x128xf32>
    %194 = arith.mulf %191, %193 : vector<8x128xf32>
    %cst_112 = arith.constant dense<0.000000e+00> : vector<128xf32>
    %195 = vector.multi_reduction <add>, %194, %cst_112 [0] : vector<8x128xf32> to vector<128xf32>
    %196 = vector.shape_cast %195 : vector<128xf32> to vector<1x128xf32>
    %cst_113 = arith.constant 8.000000e+00 : f32
    %197 = vector.broadcast %cst_113 : f32 to vector<1x128xf32>
    %198 = arith.divf %196, %197 : vector<1x128xf32>
    %199 = vector.broadcast %189 : vector<1x128xf32> to vector<8x128xf32>
    %200 = arith.subf %185, %199 : vector<8x128xf32>
    %cst_114 = arith.constant 9.99999974E-6 : f32
    %201 = vector.broadcast %cst_114 : f32 to vector<1x128xf32>
    %202 = arith.addf %198, %201 : vector<1x128xf32>
    %203 = math.rsqrt %202 : vector<1x128xf32>
    %204 = vector.broadcast %203 : vector<1x128xf32> to vector<8x128xf32>
    %205 = arith.mulf %200, %204 : vector<8x128xf32>
    %c0_i32_115 = arith.constant 0 : i32
    %c0_i32_116 = arith.constant 0 : i32
    %c896_i32 = arith.constant 896 : i32
    %c384_i32_117 = arith.constant 384 : i32
    %206 = tpu.memref_slice %arg1[%c896_i32, %c384_i32_117] : memref<1536x512xbf16, #tpu.memory_space<any>> -> memref<128x128xbf16, #tpu.memory_space<any>>
    %c0_i32_118 = arith.constant 0 : i32
    %c0_i32_119 = arith.constant 0 : i32
    %207 = tpu.memref_slice %arg4[%c0_i32_115, %c0_i32_118, %c0_i32_119] : memref<2x512x512xbf16, #tpu.memory_space<vmem>> -> memref<1x128x128xbf16, #tpu.memory_space<vmem>>
    %208 = tpu.memref_squeeze %207 : memref<1x128x128xbf16, #tpu.memory_space<vmem>> -> memref<128x128xbf16, #tpu.memory_space<vmem>>
    %209 = tpu.memref_slice %arg5[%c0_i32_116] : memref<2x!tpu.dma_semaphore, #tpu.memory_space<semaphore_mem>> -> memref<1x!tpu.dma_semaphore, #tpu.memory_space<semaphore_mem>>
    %210 = tpu.memref_squeeze %209 : memref<1x!tpu.dma_semaphore, #tpu.memory_space<semaphore_mem>> -> memref<!tpu.dma_semaphore, #tpu.memory_space<semaphore_mem>>
    tpu.enqueue_dma source(%206 : memref<128x128xbf16, #tpu.memory_space<any>>) target(%208 : memref<128x128xbf16, #tpu.memory_space<vmem>>) target_semaphore(%210 : memref<!tpu.dma_semaphore, #tpu.memory_space<semaphore_mem>>)
    %c1_i32_120 = arith.constant 1 : i32
    %c1_i32_121 = arith.constant 1 : i32
    %c1152_i32_122 = arith.constant 1152 : i32
    %c256_i32_123 = arith.constant 256 : i32
    %211 = tpu.memref_slice %arg1[%c1152_i32_122, %c256_i32_123] : memref<1536x512xbf16, #tpu.memory_space<any>> -> memref<128x128xbf16, #tpu.memory_space<any>>
    %c0_i32_124 = arith.constant 0 : i32
    %c0_i32_125 = arith.constant 0 : i32
    %212 = tpu.memref_slice %arg4[%c1_i32_120, %c0_i32_124, %c0_i32_125] : memref<2x512x512xbf16, #tpu.memory_space<vmem>> -> memref<1x128x128xbf16, #tpu.memory_space<vmem>>
    %213 = tpu.memref_squeeze %212 : memref<1x128x128xbf16, #tpu.memory_space<vmem>> -> memref<128x128xbf16, #tpu.memory_space<vmem>>
    %214 = tpu.memref_slice %arg5[%c1_i32_121] : memref<2x!tpu.dma_semaphore, #tpu.memory_space<semaphore_mem>> -> memref<1x!tpu.dma_semaphore, #tpu.memory_space<semaphore_mem>>
    %215 = tpu.memref_squeeze %214 : memref<1x!tpu.dma_semaphore, #tpu.memory_space<semaphore_mem>> -> memref<!tpu.dma_semaphore, #tpu.memory_space<semaphore_mem>>
    tpu.wait_dma2 semaphore(%215 : memref<!tpu.dma_semaphore, #tpu.memory_space<semaphore_mem>>) src(%211 : memref<128x128xbf16, #tpu.memory_space<any>>) dst(%213 : memref<128x128xbf16, #tpu.memory_space<vmem>>)
    %c1_126 = arith.constant 1 : index
    %c0_127 = arith.constant 0 : index
    %c0_128 = arith.constant 0 : index
    %216 = vector.load %arg4[%c1_126, %c0_127, %c0_128] : memref<2x512x512xbf16, #tpu.memory_space<vmem>>, vector<1x128x128xbf16>
    %217 = vector.shape_cast %216 : vector<1x128x128xbf16> to vector<128x128xbf16>
    %c5 = arith.constant 5 : index
    %c0_129 = arith.constant 0 : index
    %218 = vector.load %arg2[%c5, %c0_129] : memref<8x512xf32, #tpu.memory_space<vmem>>, vector<1x128xf32>
    %219 = arith.truncf %205 : vector<8x128xf32> to vector<8x128xbf16>
    %cst_130 = arith.constant dense<0.000000e+00> : vector<8x128xf32>
    %220 = tpu.matmul %219, %217, %cst_130 {dimension_numbers = #tpu.dot_dimension_numbers<[1], [0], [0], [1], [0, 0, 1, 1], [], []>} : vector<8x128xbf16>, vector<128x128xbf16>, vector<8x128xf32> -> vector<8x128xf32>
    %221 = vector.broadcast %218 : vector<1x128xf32> to vector<8x128xf32>
    %222 = arith.addf %220, %221 : vector<8x128xf32>
    %cst_131 = arith.constant 0.00999999977 : f32
    %223 = vector.broadcast %cst_131 : f32 to vector<8x128xf32>
    %224 = arith.mulf %223, %222 : vector<8x128xf32>
    %225 = arith.maximumf %222, %224 : vector<8x128xf32>
    %cst_132 = arith.constant dense<0.000000e+00> : vector<128xf32>
    %226 = vector.multi_reduction <add>, %225, %cst_132 [0] : vector<8x128xf32> to vector<128xf32>
    %227 = vector.shape_cast %226 : vector<128xf32> to vector<1x128xf32>
    %cst_133 = arith.constant 8.000000e+00 : f32
    %228 = vector.broadcast %cst_133 : f32 to vector<1x128xf32>
    %229 = arith.divf %227, %228 : vector<1x128xf32>
    %230 = vector.broadcast %229 : vector<1x128xf32> to vector<8x128xf32>
    %231 = arith.subf %225, %230 : vector<8x128xf32>
    %232 = vector.broadcast %229 : vector<1x128xf32> to vector<8x128xf32>
    %233 = arith.subf %225, %232 : vector<8x128xf32>
    %234 = arith.mulf %231, %233 : vector<8x128xf32>
    %cst_134 = arith.constant dense<0.000000e+00> : vector<128xf32>
    %235 = vector.multi_reduction <add>, %234, %cst_134 [0] : vector<8x128xf32> to vector<128xf32>
    %236 = vector.shape_cast %235 : vector<128xf32> to vector<1x128xf32>
    %cst_135 = arith.constant 8.000000e+00 : f32
    %237 = vector.broadcast %cst_135 : f32 to vector<1x128xf32>
    %238 = arith.divf %236, %237 : vector<1x128xf32>
    %239 = vector.broadcast %229 : vector<1x128xf32> to vector<8x128xf32>
    %240 = arith.subf %225, %239 : vector<8x128xf32>
    %cst_136 = arith.constant 9.99999974E-6 : f32
    %241 = vector.broadcast %cst_136 : f32 to vector<1x128xf32>
    %242 = arith.addf %238, %241 : vector<1x128xf32>
    %243 = math.rsqrt %242 : vector<1x128xf32>
    %244 = vector.broadcast %243 : vector<1x128xf32> to vector<8x128xf32>
    %245 = arith.mulf %240, %244 : vector<8x128xf32>
    %c0_i32_137 = arith.constant 0 : i32
    %c0_i32_138 = arith.constant 0 : i32
    %c896_i32_139 = arith.constant 896 : i32
    %c384_i32_140 = arith.constant 384 : i32
    %246 = tpu.memref_slice %arg1[%c896_i32_139, %c384_i32_140] : memref<1536x512xbf16, #tpu.memory_space<any>> -> memref<128x128xbf16, #tpu.memory_space<any>>
    %c0_i32_141 = arith.constant 0 : i32
    %c0_i32_142 = arith.constant 0 : i32
    %247 = tpu.memref_slice %arg4[%c0_i32_137, %c0_i32_141, %c0_i32_142] : memref<2x512x512xbf16, #tpu.memory_space<vmem>> -> memref<1x128x128xbf16, #tpu.memory_space<vmem>>
    %248 = tpu.memref_squeeze %247 : memref<1x128x128xbf16, #tpu.memory_space<vmem>> -> memref<128x128xbf16, #tpu.memory_space<vmem>>
    %249 = tpu.memref_slice %arg5[%c0_i32_138] : memref<2x!tpu.dma_semaphore, #tpu.memory_space<semaphore_mem>> -> memref<1x!tpu.dma_semaphore, #tpu.memory_space<semaphore_mem>>
    %250 = tpu.memref_squeeze %249 : memref<1x!tpu.dma_semaphore, #tpu.memory_space<semaphore_mem>> -> memref<!tpu.dma_semaphore, #tpu.memory_space<semaphore_mem>>
    tpu.wait_dma2 semaphore(%250 : memref<!tpu.dma_semaphore, #tpu.memory_space<semaphore_mem>>) src(%246 : memref<128x128xbf16, #tpu.memory_space<any>>) dst(%248 : memref<128x128xbf16, #tpu.memory_space<vmem>>)
    %c0_143 = arith.constant 0 : index
    %c0_144 = arith.constant 0 : index
    %c0_145 = arith.constant 0 : index
    %251 = vector.load %arg4[%c0_143, %c0_144, %c0_145] : memref<2x512x512xbf16, #tpu.memory_space<vmem>>, vector<1x128x128xbf16>
    %252 = vector.shape_cast %251 : vector<1x128x128xbf16> to vector<128x128xbf16>
    %c6 = arith.constant 6 : index
    %c0_146 = arith.constant 0 : index
    %253 = vector.load %arg2[%c6, %c0_146] : memref<8x512xf32, #tpu.memory_space<vmem>>, vector<1x128xf32>
    %254 = arith.truncf %245 : vector<8x128xf32> to vector<8x128xbf16>
    %cst_147 = arith.constant dense<0.000000e+00> : vector<8x128xf32>
    %255 = tpu.matmul %254, %252, %cst_147 {dimension_numbers = #tpu.dot_dimension_numbers<[1], [0], [0], [1], [0, 0, 1, 1], [], []>} : vector<8x128xbf16>, vector<128x128xbf16>, vector<8x128xf32> -> vector<8x128xf32>
    %256 = vector.broadcast %253 : vector<1x128xf32> to vector<8x128xf32>
    %257 = arith.addf %255, %256 : vector<8x128xf32>
    %258 = tpu.iota {dimensions = array<i32: 1>} : vector<8x128xi32>
    %c10_i32 = arith.constant 10 : i32
    %259 = vector.broadcast %c10_i32 : i32 to vector<8x128xi32>
    %260 = arith.cmpi slt, %258, %259 : vector<8x128xi32>
    %cst_148 = arith.constant -1.000000e+30 : f32
    %261 = vector.broadcast %cst_148 : f32 to vector<8x128xf32>
    %262 = arith.select %260, %257, %261 : vector<8x128xi1>, vector<8x128xf32>
    %cst_149 = arith.constant dense<0xFF800000> : vector<8xf32>
    %263 = vector.multi_reduction <maximumf>, %262, %cst_149 [1] : vector<8x128xf32> to vector<8xf32>
    %264 = vector.shape_cast %263 : vector<8xf32> to vector<8x1xf32>
    %265 = vector.broadcast %264 : vector<8x1xf32> to vector<8x128xf32>
    %266 = arith.subf %262, %265 : vector<8x128xf32>
    %267 = math.exp %266 : vector<8x128xf32>
    %cst_150 = arith.constant dense<0.000000e+00> : vector<8xf32>
    %268 = vector.multi_reduction <add>, %267, %cst_150 [1] : vector<8x128xf32> to vector<8xf32>
    %269 = vector.shape_cast %268 : vector<8xf32> to vector<8x1xf32>
    %270 = vector.broadcast %269 : vector<8x1xf32> to vector<8x128xf32>
    %271 = arith.divf %267, %270 : vector<8x128xf32>
    %c0_151 = arith.constant 0 : index
    %c0_152 = arith.constant 0 : index
    %272 = vector.load %arg3[%c0_151, %c0_152] : memref<8x128xf32, #tpu.memory_space<vmem>>, vector<8x128xf32>
    tpu.vector_store %arg3[%c0_151, %c0_152], %271 {strides = array<i32>} : memref<8x128xf32, #tpu.memory_space<vmem>>, vector<8x128xf32>,
    return
  }
}

</mosaic_0001>

<bundles_post_ra>
// kernel: tpu_custom_call.1
= control target key start
LH: loop header
LB: loop body
LE: loop exit
PB: predicated region body
PF: predicated region fallthrough
CT: control target
= control target key end

     0   :  { %8 = vsyncpa [#allocation5], 0  ;;  %s2268_s0 = inlined_call_operand.hbm [shape: f32[8,64], index: 0, kind: input, shape index: {}]   ;;  %s2269_s1 = inlined_call_operand.hbm [shape: bf16[1536,512], index: 1, kind: input, shape index: {}]   ;;  %s2270_s2 = inlined_call_operand.hbm [shape: f32[8,512], index: 2, kind: input, shape index: {}]   ;;  %s2271_s3 = inlined_call_operand.hbm [shape: f32[8,128], index: 3, kind: output, shape index: {}]  }
   0x1   :  { %9 = vsyncpa [#allocation8], 0 }
   0x2   :  { %10 = vsyncpa [#allocation6], 0  ;;  %s1991_s12 = smov [#allocation4]   ;;  %s1992_s14 = smov [#allocation7]  }
   0x3   :  { %s17_s13 = sshll.u32 %s1991_s12, 4  ;;  %s27_s15 = sshll.u32 %s1992_s14, 4  ;;  %s18_s13 = int_to_ptr.vmem [resolvable:$true] %s17_s13  ;;  %s28_s15 = int_to_ptr.vmem [resolvable:$true] %s27_s15 }
   0x4   :  { %s1905_s18 = scalar_lea.hbm %s2268_s0, 128 }
   0x5   :  { %p1906_p0 = scmp.ne.s32.totalorder %s2268_s0, %s1905_s18  ;;  %p1909_p1 = scmp.lt.u32.totalorder %s1905_s18, %s2268_s0 }
   0x7   :  { %p1911_p2 = pnand %p1909_p1, %p1906_p0 }
   0x9   :  { %1914 = shalt.err (!%p1911_p2)
}
   0xa   :  { %s1915_s23 = scalar_lea.vmem %s18_s13, 128  ;;  %p1920_p4 = scmp.lt.s32.totalorder %s18_s13, %s18_s13 }
   0xb   :  { %p1916_p3 = scmp.ne.s32.totalorder %s18_s13, %s1915_s23  ;;  %p1921_p5 = scmp.lt.s32.totalorder %s1915_s23, %s1915_s23 }
   0xd   :  { %p1922_p6 = por %p1921_p5, %p1920_p4 }
   0xf   :  { %p1923_p7 = pnand %p1922_p6, %p1916_p3 }
  0x11   :  { %1926 = shalt.err (!%p1923_p7)
}
  0x12   :  { %20 = dma.hbm_to_vmem [thread:$0]  %s2268_s0, 128, %s18_s13, [#allocation5]  }
  0x13   :  { %s1927_s28 = scalar_lea.hbm %s2270_s2, 512 }
  0x14   :  { %p1928_p8 = scmp.ne.s32.totalorder %s2270_s2, %s1927_s28  ;;  %p1931_p9 = scmp.lt.u32.totalorder %s1927_s28, %s2270_s2 }
  0x16   :  { %p1933_p10 = pnand %p1931_p9, %p1928_p8 }
  0x18   :  { %1936 = shalt.err (!%p1933_p10)
}
  0x19   :  { %s1937_s6 = scalar_lea.vmem %s28_s15, 512  ;;  %p1942_p12 = scmp.lt.s32.totalorder %s28_s15, %s28_s15 }
  0x1a   :  { %p1938_p11 = scmp.ne.s32.totalorder %s28_s15, %s1937_s6  ;;  %p1943_p13 = scmp.lt.s32.totalorder %s1937_s6, %s1937_s6 }
  0x1c   :  { %p1944_p0 = por %p1943_p13, %p1942_p12 }
  0x1e   :  { %p1945_p1 = pnand %p1944_p0, %p1938_p11 }
  0x20   :  { %1948 = shalt.err (!%p1945_p1)
}
  0x21   :  { %30 = dma.hbm_to_vmem [thread:$0]  %s2270_s2, 512, %s28_s15, [#allocation8]  }
  0x22   :  { %1971 = dma.done.wait [#allocation5], 128  }
  0x23   :  { %1972 = vsyncadd [#allocation5], 4294967168 }
  0x24   :  { %1973 = dma.done.wait [#allocation8], 512  }
  0x25   :  { %1974 = vsyncadd [#allocation8], 4294966784  ;;  %s42_s8 = sld [smem:[#allocation0]]   ;;  %s1993_s9 = smov 512  }
  0x26   :  { %54 = sst [smem:[#allocation11]] %s1993_s9  ;;  %s1994_s10 = smov 4  }
  0x27   :  { %56 = sst [smem:[#allocation11 + $0x1]] %s1993_s9  ;;  %s1995_s11 = smov 64  }
  0x28   :  { %58 = sst [smem:[#allocation11 + $0x2]] %s1994_s10  ;;  %s1996_s12 = smov 128  }
  0x29   :  { %60 = sst [smem:[#allocation11 + $0x3]] %s1995_s11  ;;  %s1997_s2 = smov 2  }
  0x2a   :  { %62 = sst [smem:[#allocation11 + $0x4]] %s1996_s12  ;;  %s1998_s14 = smov 256  }
  0x2b   :  { %64 = sst [smem:[#allocation11 + $0x5]] %s1997_s2  ;;  %s1681_s13 = sshll.u32 %s42_s8, 26 }
  0x2c   :  { %66 = sst [smem:[#allocation11 + $0x6]] %s1998_s14  ;;  %s2066_s15 = sadd.s32 134217728, %s1681_s13 }
  0x2d   :  { %68 = sst [smem:[#allocation11 + $0x7]] %s1995_s11  ;;  %s1999_s16 = smov [#allocation2]  }
  0x2e   :  { %70 = sst [smem:[#allocation11 + $0x8]] %s1994_s10  ;;  %s50_s17 = sshll.u32 %s1999_s16, 4  ;;  %s2070_s17 = int_to_ptr.vmem [resolvable:$true] %s50_s17 }
  0x2f   :  { %s2000_s18 = smov [#allocation3]   ;;  %s2001_s19 = smov [#allocation10]  }
  0x30   :  { %72 = dma.general %s2269_s1, 2048, %s2070_s17, %s2000_s18, %s2001_s19, [#allocation11], %s2066_s15, 0  }
  0x31   :  { %92 = sst [smem:[#allocation13]] %s1993_s9  ;;  %s2002_s22 = smov [#allocation2 + $0x400]   ;;  %v73_v0 = vld [vmem:[#allocation4] sm:$0xff] }
  0x32   :  { %94 = sst [smem:[#allocation13 + $0x1]] %s1993_s9  ;;  %s88_s23 = sshll.u32 %s2002_s22, 4  ;;  %s2086_s23 = int_to_ptr.vmem [resolvable:$true] %s88_s23 }
  0x33   :  { %96 = sst [smem:[#allocation13 + $0x2]] %s1994_s10  ;;  %s74_s26 = scalar_lea.hbm %s2269_s1, 4096 }
  0x34   :  { %98 = sst [smem:[#allocation13 + $0x3]] %s1995_s11  ;;  %s2003_s27 = smov [#allocation3 + $0x1]  }
  0x35   :  { %100 = sst [smem:[#allocation13 + $0x4]] %s1996_s12  ;;  %s2004_s28 = smov [#allocation12]  }
  0x36   :  { %102 = sst [smem:[#allocation13 + $0x5]] %s1997_s2 }
  0x37   :  { %104 = sst [smem:[#allocation13 + $0x6]] %s1998_s14 }
  0x38   :  { %106 = sst [smem:[#allocation13 + $0x7]] %s1995_s11 }
  0x39   :  { %108 = sst [smem:[#allocation13 + $0x8]] %s1994_s10 }
  0x3a   :  { %110 = dma.general %s74_s26, 16384, %s2086_s23, %s2003_s27, %s2004_s28, [#allocation13], %s2066_s15, 0  }
  0x3b   :  { %1975 = dma.done.wait [#allocation3], 2048 }
  0x3c   :  { %1976 = vsyncadd [#allocation3], 4294965248  ;;  %341 = sst [smem:[#allocation15]] %s1993_s9  ;;  %v2005_v1 = vmov 0   ;;  %s2006_s29 = smov 3   ;;  %v116_v2 = vld [vmem:[#allocation2 + $0x8] sm:$0xff]  ;;  %v132_v18 = vpack.c.bf16 %v73_v0, %v73_v0  ;;  %v134_v20 = vlaneseq }
  0x3d   :  { %190 = vmatprep.mubr.bf16.mxu0 %v2005_v1  ;;  %231 = vmatprep.mubr.bf16.mxu1 %v2005_v1  ;;  %343 = sst [smem:[#allocation15 + $0x1]] %s1993_s9  ;;  %v118_v3 = vld [vmem:[#allocation2 + $0x18] sm:$0xff]  ;;  %v115_v4 = vld [vmem:[#allocation2] sm:$0xff]  ;;  %v117_v5 = vld [vmem:[#allocation2 + $0x10] sm:$0xff]  ;;  %vm154_vm0 = vcmask 523264   ;;  %s325_s5 = scalar_lea.hbm %s2269_s1, 20480 }
  0x3e   :  { %345 = sst [smem:[#allocation15 + $0x2]] %s2006_s29  ;;  %158 = vmatprep.subr.bf16.mxu0 %v116_v2  ;;  %199 = vmatprep.subr.bf16.mxu1 %v118_v3  ;;  %v120_v6 = vld [vmem:[#allocation2 + $0x28] sm:$0xff]  ;;  %v122_v7 = vld [vmem:[#allocation2 + $0x38] sm:$0xff]  ;;  %v119_v8 = vld [vmem:[#allocation2 + $0x20] sm:$0xff]  ;;  %s2007_s6 = smov [#allocation14]   ;;  %v2112_v21 = vshrl.u32 %v134_v20, 7 }
  0x3f   :  { %347 = sst [smem:[#allocation15 + $0x3]] %s1995_s11  ;;  %159 = vmatpush1.bf16.msra.mxu0 %v115_v4  ;;  %200 = vmatpush1.bf16.msra.mxu1 %v117_v5  ;;  %v121_v9 = vld [vmem:[#allocation2 + $0x30] sm:$0xff]  ;;  %v124_v10 = vld [vmem:[#allocation2 + $0x48] sm:$0xff]  ;;  %v126_v11 = vld [vmem:[#allocation2 + $0x58] sm:$0xff] }
  0x40   :  { %349 = sst [smem:[#allocation15 + $0x4]] %s1996_s12  ;;  %160 = vmatprep.subr.bf16.mxu0 %v120_v6  ;;  %201 = vmatprep.subr.bf16.mxu1 %v122_v7  ;;  %v123_v12 = vld [vmem:[#allocation2 + $0x40] sm:$0xff]  ;;  %v125_v13 = vld [vmem:[#allocation2 + $0x50] sm:$0xff]  ;;  %v128_v14 = vld [vmem:[#allocation2 + $0x68] sm:$0xff]  ;;  %v2115_v22 = vsub.s32 0, %v2112_v21  ;;  %v2118_v23 = vsub.s32 2, %v2112_v21 }
  0x41   :  { %351 = sst [smem:[#allocation15 + $0x5]] %s1997_s2  ;;  %v130_v15 = vld [vmem:[#allocation2 + $0x78] sm:$0xff]  ;;  %v127_v16 = vld [vmem:[#allocation2 + $0x60] sm:$0xff]  ;;  %v129_v17 = vld [vmem:[#allocation2 + $0x70] sm:$0xff]  ;;  %v2121_v24 = vsub.s32 1, %v2112_v21  ;;  %v148_v25 = vsub.s32 3, %v2112_v21 }
  0x42   :  { %353 = sst [smem:[#allocation15 + $0x6]] %s1998_s14  ;;  %v131_v19 = vld [vmem:[#allocation7] ss:$8 sm:$0xf] }
  0x43   :  { %355 = sst [smem:[#allocation15 + $0x7]] %s1995_s11  ;;  %161 = vmatpush1.bf16.msra.mxu0 %v119_v8  ;;  %202 = vmatpush1.bf16.msra.mxu1 %v121_v9  ;;  %v137_v26 = vrot.slane %v131_v19, %v2115_v22  ;;  %v145_v27 = vrot.slane %v131_v19, %v2118_v23  ;;  %v141_v28 = vrot.slane %v131_v19, %v2121_v24 }
  0x44   :  { %357 = sst [smem:[#allocation15 + $0x8]] %s1994_s10  ;;  %162 = vmatprep.subr.bf16.mxu0 %v124_v10  ;;  %203 = vmatprep.subr.bf16.mxu1 %v126_v11  ;;  %v149_v29 = vrot.slane %v131_v19, %v148_v25 }
  0x45   :  { %359 = dma.general %s325_s5, 12288, %s2070_s17, %s2000_s18, %s2007_s6, [#allocation15], %s2066_s15, 0  }
  0x47   :  { %163 = vmatpush1.bf16.msra.mxu0 %v123_v12  ;;  %204 = vmatpush1.bf16.msra.mxu1 %v125_v13 }
  0x48   :  { %164 = vmatprep.subr.bf16.mxu0 %v128_v14  ;;  %205 = vmatprep.subr.bf16.mxu1 %v130_v15 }
  0x4b   :  { %165 = vmatpush1.bf16.msra.mxu0 %v127_v16  ;;  %206 = vmatpush1.bf16.msra.mxu1 %v129_v17 }
  0x4e   :  { %1685 = vmatmul.mubr.msk.bf16.vlgmr.msra.gmra.mrb[0].mxu0 %vm154_vm0, %v132_v18  ;;  %1686 = vmatmul.mubr.msk.bf16.vlgmr.msra.gmra.mrb[0].mxu1 %vm154_vm0, %v132_v18 }
 0x121   :  { %v192_v30 = vpop.f32.mrb[0].mxu0  ;;  %v233_v31 = vpop.f32.mrb[0].mxu1 }
 0x122   :  { %v193_v32 = vadd.f32 %v192_v30, %v137_v26  ;;  %v234_v33 = vadd.f32 %v233_v31, %v145_v27  ;;  %v194_v34 = vpop.f32.mrb[1].mxu0  ;;  %v235_v35 = vpop.f32.mrb[1].mxu1 }
 0x123   :  { %v195_v36 = vadd.f32 %v194_v34, %v141_v28  ;;  %v236_v37 = vadd.f32 %v235_v35, %v149_v29  ;;  %v196_v38 = vpop.f32.mrb[2].mxu0  ;;  %v237_v39 = vpop.f32.mrb[2].mxu1 }
 0x124   :  { %v240_v40 = vmul.f32 0.01, %v193_v32  ;;  %v242_v41 = vmul.f32 0.01, %v234_v33  ;;  %v197_v42 = vpop.f32.mrb[3].mxu0  ;;  %v238_v43 = vpop.f32.mrb[3].mxu1 }
 0x125   :  { %v241_v44 = vmul.f32 0.01, %v195_v36  ;;  %v243_v45 = vmul.f32 0.01, %v236_v37 }
 0x126   :  { %v244_v46 = vmax.f32 %v193_v32, %v240_v40  ;;  %v246_v47 = vmax.f32 %v234_v33, %v242_v41 }
 0x127   :  { %v245_v48 = vmax.f32 %v195_v36, %v241_v44  ;;  %v247_v49 = vmax.f32 %v236_v37, %v243_v45 }
 0x128   :  { %v248_v50 = vrot.slane %v244_v46, 4  ;;  %v260_v51 = vrot.slane %v246_v47, 4 }
 0x129   :  { %v254_v52 = vrot.slane %v245_v48, 4  ;;  %v266_v53 = vrot.slane %v247_v49, 4 }
 0x12a   :  { %v249_v54 = vadd.f32 %v248_v50, %v244_v46  ;;  %v261_v55 = vadd.f32 %v260_v51, %v246_v47 }
 0x12b   :  { %v255_v56 = vadd.f32 %v254_v52, %v245_v48  ;;  %v267_v57 = vadd.f32 %v266_v53, %v247_v49 }
 0x12c   :  { %v250_v58 = vrot.slane %v249_v54, 2  ;;  %v262_v59 = vrot.slane %v261_v55, 2 }
 0x12d   :  { %v256_v60 = vrot.slane %v255_v56, 2  ;;  %v268_v61 = vrot.slane %v267_v57, 2 }
 0x12e   :  { %v251_v62 = vadd.f32 %v250_v58, %v249_v54  ;;  %v263_v63 = vadd.f32 %v262_v59, %v261_v55 }
 0x12f   :  { %v257_v0 = vadd.f32 %v256_v60, %v255_v56  ;;  %v269_v2 = vadd.f32 %v268_v61, %v267_v57 }
 0x130   :  { %v252_v3 = vrot.slane %v251_v62, 1  ;;  %v264_v4 = vrot.slane %v263_v63, 1 }
 0x131   :  { %v258_v5 = vrot.slane %v257_v0, 1  ;;  %v270_v6 = vrot.slane %v269_v2, 1 }
 0x132   :  { %v253_v7 = vadd.f32 %v252_v3, %v251_v62  ;;  %v265_v8 = vadd.f32 %v264_v4, %v263_v63 }
 0x133   :  { %v259_v9 = vadd.f32 %v258_v5, %v257_v0  ;;  %v271_v10 = vadd.f32 %v270_v6, %v269_v2 }
 0x134   :  { %v273_v11 = vmul.f32 0.125, %v253_v7  ;;  %v275_v12 = vmul.f32 0.125, %v265_v8 }
 0x135   :  { %v274_v13 = vmul.f32 0.125, %v259_v9  ;;  %v276_v14 = vmul.f32 0.125, %v271_v10 }
 0x136   :  { %v277_v15 = vsub.f32 %v244_v46, %v273_v11  ;;  %v279_v16 = vsub.f32 %v246_v47, %v275_v12 }
 0x137   :  { %v278_v17 = vsub.f32 %v245_v48, %v274_v13  ;;  %v280_v18 = vsub.f32 %v247_v49, %v276_v14 }
 0x138   :  { %v281_v19 = vmul.f32 %v277_v15, %v277_v15  ;;  %v283_v26 = vmul.f32 %v279_v16, %v279_v16 }
 0x139   :  { %v282_v27 = vmul.f32 %v278_v17, %v278_v17  ;;  %v284_v28 = vmul.f32 %v280_v18, %v280_v18 }
 0x13a   :  { %v285_v29 = vrot.slane %v281_v19, 4  ;;  %v297_v30 = vrot.slane %v283_v26, 4 }
 0x13b   :  { %v291_v31 = vrot.slane %v282_v27, 4  ;;  %v303_v32 = vrot.slane %v284_v28, 4 }
 0x13c   :  { %v286_v33 = vadd.f32 %v285_v29, %v281_v19  ;;  %v298_v34 = vadd.f32 %v297_v30, %v283_v26 }
 0x13d   :  { %v292_v35 = vadd.f32 %v291_v31, %v282_v27  ;;  %v304_v36 = vadd.f32 %v303_v32, %v284_v28 }
 0x13e   :  { %v287_v37 = vrot.slane %v286_v33, 2  ;;  %v299_v38 = vrot.slane %v298_v34, 2 }
 0x13f   :  { %v293_v39 = vrot.slane %v292_v35, 2  ;;  %v305_v40 = vrot.slane %v304_v36, 2 }
 0x140   :  { %v288_v41 = vadd.f32 %v287_v37, %v286_v33  ;;  %v300_v42 = vadd.f32 %v299_v38, %v298_v34 }
 0x141   :  { %v294_v43 = vadd.f32 %v293_v39, %v292_v35  ;;  %v306_v44 = vadd.f32 %v305_v40, %v304_v36 }
 0x142   :  { %v289_v45 = vrot.slane %v288_v41, 1  ;;  %v301_v46 = vrot.slane %v300_v42, 1 }
 0x143   :  { %v295_v47 = vrot.slane %v294_v43, 1  ;;  %v307_v48 = vrot.slane %v306_v44, 1 }
 0x144   :  { %v290_v49 = vadd.f32 %v289_v45, %v288_v41  ;;  %v302_v50 = vadd.f32 %v301_v46, %v300_v42 }
 0x145   :  { %v296_v51 = vadd.f32 %v295_v47, %v294_v43  ;;  %v308_v52 = vadd.f32 %v307_v48, %v306_v44 }
 0x146   :  { %v309_v53 = vmul.f32 0.125, %v290_v49  ;;  %v311_v54 = vmul.f32 0.125, %v302_v50 }
 0x147   :  { %v310_v55 = vmul.f32 0.125, %v296_v51  ;;  %v312_v56 = vmul.f32 0.125, %v308_v52 }
 0x148   :  { %v313_v57 = vadd.f32 1e-05, %v309_v53  ;;  %v315_v58 = vadd.f32 1e-05, %v311_v54 }
 0x149   :  { %v314_v59 = vadd.f32 1e-05, %v310_v55  ;;  %v316_v60 = vadd.f32 1e-05, %v312_v56 }
 0x14a   :  { %1871 = vrsqrt.f32 %v313_v57 }
 0x14b   :  { %1873 = vrsqrt.f32 %v315_v58 }
 0x14c   :  { %1875 = vrsqrt.f32 %v314_v59 }
 0x14d   :  { %1877 = vrsqrt.f32 %v316_v60 }
 0x154   :  { %v1872_v61 = vpop.eup %1871 }
 0x155   :  { %v1874_v62 = vpop.eup %1873  ;;  %v2129_v63 = vmul.f32 %v1872_v61, %v277_v15 }
 0x156   :  { %v1876_v0 = vpop.eup %1875  ;;  %v2131_v2 = vmul.f32 %v1874_v62, %v279_v16 }
 0x157   :  { %v1878_v3 = vpop.eup %1877  ;;  %v322_v4 = vmul.f32 %v1876_v0, %v278_v17 }
 0x158   :  { %v2133_v5 = vmul.f32 %v1878_v3, %v280_v18 }
 0x159   :  { %1977 = dma.done.wait [#allocation3 + $0x1], 16384 }
 0x15a   :  { %1978 = vsyncadd [#allocation3 + $0x1], 4294950912  ;;  %v495_v6 = vpack.c.bf16 %v322_v4, %v322_v4  ;;  %783 = sst [smem:[#allocation17]] %s1993_s9  ;;  %v365_v7 = vld [vmem:[#allocation2 + $0x408] sm:$0xff]  ;;  %v367_v8 = vld [vmem:[#allocation2 + $0x418] sm:$0xff]  ;;  %s767_s8 = scalar_lea.hbm %s2269_s1, 36864 }
 0x15b   :  { %785 = sst [smem:[#allocation17 + $0x1]] %s1993_s9  ;;  %v364_v9 = vld [vmem:[#allocation2 + $0x400] sm:$0xff]  ;;  %519 = vmatprep.subr.bf16.mxu0 %v365_v7  ;;  %601 = vmatprep.subr.bf16.mxu1 %v367_v8  ;;  %v366_v10 = vld [vmem:[#allocation2 + $0x410] sm:$0xff]  ;;  %v369_v11 = vld [vmem:[#allocation2 + $0x428] sm:$0xff] }
 0x15c   :  { %551 = vmatprep.mubr.bf16.mxu0 %v495_v6  ;;  %633 = vmatprep.mubr.bf16.mxu1 %v495_v6  ;;  %787 = sst [smem:[#allocation17 + $0x2]] %s1997_s2  ;;  %v371_v12 = vld [vmem:[#allocation2 + $0x438] sm:$0xff]  ;;  %v368_v13 = vld [vmem:[#allocation2 + $0x420] sm:$0xff]  ;;  %v370_v14 = vld [vmem:[#allocation2 + $0x430] sm:$0xff] }
 0x15d   :  { %789 = sst [smem:[#allocation17 + $0x3]] %s1995_s11  ;;  %520 = vmatpush1.bf16.msra.mxu0 %v364_v9  ;;  %602 = vmatpush1.bf16.msra.mxu1 %v366_v10  ;;  %v373_v15 = vld [vmem:[#allocation2 + $0x448] sm:$0xff]  ;;  %v375_v16 = vld [vmem:[#allocation2 + $0x458] sm:$0xff]  ;;  %v372_v17 = vld [vmem:[#allocation2 + $0x440] sm:$0xff] }
 0x15e   :  { %791 = sst [smem:[#allocation17 + $0x4]] %s1996_s12  ;;  %521 = vmatprep.subr.bf16.mxu0 %v369_v11  ;;  %603 = vmatprep.subr.bf16.mxu1 %v371_v12  ;;  %v374_v18 = vld [vmem:[#allocation2 + $0x450] sm:$0xff]  ;;  %v377_v19 = vld [vmem:[#allocation2 + $0x468] sm:$0xff]  ;;  %v379_v26 = vld [vmem:[#allocation2 + $0x478] sm:$0xff]  ;;  %s2008_s12 = smov [#allocation16]  }
 0x15f   :  { %793 = sst [smem:[#allocation17 + $0x5]] %s1997_s2  ;;  %v376_v27 = vld [vmem:[#allocation2 + $0x460] sm:$0xff]  ;;  %v378_v28 = vld [vmem:[#allocation2 + $0x470] sm:$0xff]  ;;  %v381_v29 = vld [vmem:[#allocation2 + $0x488] sm:$0xff] }
 0x160   :  { %795 = sst [smem:[#allocation17 + $0x6]] %s1998_s14  ;;  %v383_v30 = vld [vmem:[#allocation2 + $0x498] sm:$0xff]  ;;  %v380_v31 = vld [vmem:[#allocation2 + $0x480] sm:$0xff]  ;;  %v382_v32 = vld [vmem:[#allocation2 + $0x490] sm:$0xff] }
 0x161   :  { %797 = sst [smem:[#allocation17 + $0x7]] %s1995_s11  ;;  %522 = vmatpush1.bf16.msra.mxu0 %v368_v13  ;;  %604 = vmatpush1.bf16.msra.mxu1 %v370_v14  ;;  %v385_v33 = vld [vmem:[#allocation2 + $0x4a8] sm:$0xff]  ;;  %v387_v34 = vld [vmem:[#allocation2 + $0x4b8] sm:$0xff]  ;;  %v384_v35 = vld [vmem:[#allocation2 + $0x4a0] sm:$0xff] }
 0x162   :  { %799 = sst [smem:[#allocation17 + $0x8]] %s1994_s10  ;;  %523 = vmatprep.subr.bf16.mxu0 %v373_v15  ;;  %605 = vmatprep.subr.bf16.mxu1 %v375_v16  ;;  %v386_v36 = vld [vmem:[#allocation2 + $0x4b0] sm:$0xff]  ;;  %v389_v37 = vld [vmem:[#allocation2 + $0x4c8] sm:$0xff]  ;;  %v391_v38 = vld [vmem:[#allocation2 + $0x4d8] sm:$0xff] }
 0x163   :  { %v388_v39 = vld [vmem:[#allocation2 + $0x4c0] sm:$0xff]  ;;  %v390_v40 = vld [vmem:[#allocation2 + $0x4d0] sm:$0xff]  ;;  %v393_v41 = vld [vmem:[#allocation2 + $0x4e8] sm:$0xff] }
 0x164   :  { %v395_v42 = vld [vmem:[#allocation2 + $0x4f8] sm:$0xff]  ;;  %v392_v43 = vld [vmem:[#allocation2 + $0x4e0] sm:$0xff]  ;;  %v394_v44 = vld [vmem:[#allocation2 + $0x4f0] sm:$0xff] }
 0x165   :  { %524 = vmatpush1.bf16.msra.mxu0 %v372_v17  ;;  %606 = vmatpush1.bf16.msra.mxu1 %v374_v18  ;;  %v397_v45 = vld [vmem:[#allocation2 + $0x508] sm:$0xff]  ;;  %v399_v46 = vld [vmem:[#allocation2 + $0x518] sm:$0xff]  ;;  %v396_v47 = vld [vmem:[#allocation2 + $0x500] sm:$0xff] }
 0x166   :  { %525 = vmatprep.subr.bf16.mxu0 %v377_v19  ;;  %607 = vmatprep.subr.bf16.mxu1 %v379_v26  ;;  %v398_v48 = vld [vmem:[#allocation2 + $0x510] sm:$0xff]  ;;  %v401_v49 = vld [vmem:[#allocation2 + $0x528] sm:$0xff]  ;;  %v403_v50 = vld [vmem:[#allocation2 + $0x538] sm:$0xff]  ;;  %v494_v19 = vpack.c.bf16 %v2129_v63, %v2129_v63 }
 0x167   :  { %v400_v51 = vld [vmem:[#allocation2 + $0x520] sm:$0xff]  ;;  %v402_v52 = vld [vmem:[#allocation2 + $0x530] sm:$0xff]  ;;  %v405_v53 = vld [vmem:[#allocation2 + $0x548] sm:$0xff] }
 0x168   :  { %v407_v54 = vld [vmem:[#allocation2 + $0x558] sm:$0xff]  ;;  %v404_v55 = vld [vmem:[#allocation2 + $0x540] sm:$0xff]  ;;  %v406_v56 = vld [vmem:[#allocation2 + $0x550] sm:$0xff] }
 0x169   :  { %526 = vmatpush1.bf16.msra.mxu0 %v376_v27  ;;  %608 = vmatpush1.bf16.msra.mxu1 %v378_v28  ;;  %v409_v57 = vld [vmem:[#allocation2 + $0x568] sm:$0xff]  ;;  %v411_v58 = vld [vmem:[#allocation2 + $0x578] sm:$0xff]  ;;  %v408_v59 = vld [vmem:[#allocation2 + $0x560] sm:$0xff] }
 0x16a   :  { %527 = vmatprep.subr.bf16.mxu0 %v381_v29  ;;  %609 = vmatprep.subr.bf16.mxu1 %v383_v30  ;;  %v410_v60 = vld [vmem:[#allocation2 + $0x570] sm:$0xff]  ;;  %v413_v61 = vld [vmem:[#allocation2 + $0x588] sm:$0xff]  ;;  %v415_v62 = vld [vmem:[#allocation2 + $0x598] sm:$0xff]  ;;  %v497_v30 = vpack.c.bf16 %v2133_v5, %v2133_v5 }
 0x16b   :  { %v412_v0 = vld [vmem:[#allocation2 + $0x580] sm:$0xff]  ;;  %v414_v3 = vld [vmem:[#allocation2 + $0x590] sm:$0xff]  ;;  %v417_v4 = vld [vmem:[#allocation2 + $0x5a8] sm:$0xff] }
 0x16c   :  { %v419_v6 = vld [vmem:[#allocation2 + $0x5b8] sm:$0xff]  ;;  %v416_v7 = vld [vmem:[#allocation2 + $0x5a0] sm:$0xff]  ;;  %v418_v8 = vld [vmem:[#allocation2 + $0x5b0] sm:$0xff] }
 0x16d   :  { %528 = vmatpush1.bf16.msra.mxu0 %v380_v31  ;;  %610 = vmatpush1.bf16.msra.mxu1 %v382_v32  ;;  %v421_v9 = vld [vmem:[#allocation2 + $0x5c8] sm:$0xff]  ;;  %v423_v10 = vld [vmem:[#allocation2 + $0x5d8] sm:$0xff]  ;;  %v420_v11 = vld [vmem:[#allocation2 + $0x5c0] sm:$0xff] }
 0x16e   :  { %529 = vmatprep.subr.bf16.mxu0 %v385_v33  ;;  %611 = vmatprep.subr.bf16.mxu1 %v387_v34  ;;  %v422_v12 = vld [vmem:[#allocation2 + $0x5d0] sm:$0xff]  ;;  %v425_v13 = vld [vmem:[#allocation2 + $0x5e8] sm:$0xff]  ;;  %v427_v14 = vld [vmem:[#allocation2 + $0x5f8] sm:$0xff] }
 0x16f   :  { %v424_v15 = vld [vmem:[#allocation2 + $0x5e0] sm:$0xff]  ;;  %v426_v16 = vld [vmem:[#allocation2 + $0x5f0] sm:$0xff]  ;;  %v429_v17 = vld [vmem:[#allocation2 + $0x608] sm:$0xff] }
 0x170   :  { %v431_v18 = vld [vmem:[#allocation2 + $0x618] sm:$0xff]  ;;  %v428_v26 = vld [vmem:[#allocation2 + $0x600] sm:$0xff]  ;;  %v430_v27 = vld [vmem:[#allocation2 + $0x610] sm:$0xff] }
 0x171   :  { %530 = vmatpush1.bf16.msra.mxu0 %v384_v35  ;;  %612 = vmatpush1.bf16.msra.mxu1 %v386_v36  ;;  %v433_v28 = vld [vmem:[#allocation2 + $0x628] sm:$0xff]  ;;  %v435_v29 = vld [vmem:[#allocation2 + $0x638] sm:$0xff]  ;;  %v432_v31 = vld [vmem:[#allocation2 + $0x620] sm:$0xff] }
 0x172   :  { %531 = vmatprep.subr.bf16.mxu0 %v389_v37  ;;  %613 = vmatprep.subr.bf16.mxu1 %v391_v38  ;;  %v434_v32 = vld [vmem:[#allocation2 + $0x630] sm:$0xff]  ;;  %v437_v63 = vld [vmem:[#allocation2 + $0x648] sm:$0xff]  ;;  %v439_v33 = vld [vmem:[#allocation2 + $0x658] sm:$0xff] }
 0x173   :  { %v436_v34 = vld [vmem:[#allocation2 + $0x640] sm:$0xff]  ;;  %v438_v35 = vld [vmem:[#allocation2 + $0x650] sm:$0xff]  ;;  %v441_v36 = vld [vmem:[#allocation2 + $0x668] sm:$0xff] }
 0x174   :  { %v443_v5 = vld [vmem:[#allocation2 + $0x678] sm:$0xff]  ;;  %v440_v37 = vld [vmem:[#allocation2 + $0x660] sm:$0xff]  ;;  %v442_v38 = vld [vmem:[#allocation2 + $0x670] sm:$0xff] }
 0x175   :  { %532 = vmatpush1.bf16.msra.mxu0 %v388_v39  ;;  %614 = vmatpush1.bf16.msra.mxu1 %v390_v40  ;;  %v445_v39 = vld [vmem:[#allocation2 + $0x688] sm:$0xff]  ;;  %v447_v40 = vld [vmem:[#allocation2 + $0x698] sm:$0xff] }
 0x176   :  { %533 = vmatprep.subr.bf16.mxu0 %v393_v41  ;;  %615 = vmatprep.subr.bf16.mxu1 %v395_v42  ;;  %v444_v41 = vld [vmem:[#allocation2 + $0x680] sm:$0xff]  ;;  %v446_v42 = vld [vmem:[#allocation2 + $0x690] sm:$0xff] }
 0x179   :  { %534 = vmatpush1.bf16.msra.mxu0 %v392_v43  ;;  %616 = vmatpush1.bf16.msra.mxu1 %v394_v44  ;;  %v449_v43 = vld [vmem:[#allocation2 + $0x6a8] sm:$0xff]  ;;  %v451_v44 = vld [vmem:[#allocation2 + $0x6b8] sm:$0xff] }
 0x17a   :  { %535 = vmatprep.subr.bf16.mxu0 %v397_v45  ;;  %617 = vmatprep.subr.bf16.mxu1 %v399_v46  ;;  %v448_v45 = vld [vmem:[#allocation2 + $0x6a0] sm:$0xff]  ;;  %v450_v46 = vld [vmem:[#allocation2 + $0x6b0] sm:$0xff] }
 0x17d   :  { %536 = vmatpush1.bf16.msra.mxu0 %v396_v47  ;;  %618 = vmatpush1.bf16.msra.mxu1 %v398_v48  ;;  %v453_v47 = vld [vmem:[#allocation2 + $0x6c8] sm:$0xff]  ;;  %v455_v48 = vld [vmem:[#allocation2 + $0x6d8] sm:$0xff] }
 0x17e   :  { %537 = vmatprep.subr.bf16.mxu0 %v401_v49  ;;  %619 = vmatprep.subr.bf16.mxu1 %v403_v50  ;;  %v452_v49 = vld [vmem:[#allocation2 + $0x6c0] sm:$0xff]  ;;  %v454_v50 = vld [vmem:[#allocation2 + $0x6d0] sm:$0xff] }
 0x181   :  { %538 = vmatpush1.bf16.msra.mxu0 %v400_v51  ;;  %620 = vmatpush1.bf16.msra.mxu1 %v402_v52  ;;  %v457_v51 = vld [vmem:[#allocation2 + $0x6e8] sm:$0xff]  ;;  %v459_v52 = vld [vmem:[#allocation2 + $0x6f8] sm:$0xff] }
 0x182   :  { %539 = vmatprep.subr.bf16.mxu0 %v405_v53  ;;  %621 = vmatprep.subr.bf16.mxu1 %v407_v54  ;;  %v456_v53 = vld [vmem:[#allocation2 + $0x6e0] sm:$0xff]  ;;  %v458_v54 = vld [vmem:[#allocation2 + $0x6f0] sm:$0xff] }
 0x185   :  { %540 = vmatpush1.bf16.msra.mxu0 %v404_v55  ;;  %622 = vmatpush1.bf16.msra.mxu1 %v406_v56  ;;  %v461_v55 = vld [vmem:[#allocation2 + $0x708] sm:$0xff]  ;;  %v463_v56 = vld [vmem:[#allocation2 + $0x718] sm:$0xff] }
 0x186   :  { %541 = vmatprep.subr.bf16.mxu0 %v409_v57  ;;  %623 = vmatprep.subr.bf16.mxu1 %v411_v58  ;;  %v460_v57 = vld [vmem:[#allocation2 + $0x700] sm:$0xff]  ;;  %v462_v58 = vld [vmem:[#allocation2 + $0x710] sm:$0xff] }
 0x189   :  { %542 = vmatpush1.bf16.msra.mxu0 %v408_v59  ;;  %624 = vmatpush1.bf16.msra.mxu1 %v410_v60  ;;  %v465_v59 = vld [vmem:[#allocation2 + $0x728] sm:$0xff]  ;;  %v467_v60 = vld [vmem:[#allocation2 + $0x738] sm:$0xff] }
 0x18a   :  { %543 = vmatprep.subr.bf16.mxu0 %v413_v61  ;;  %625 = vmatprep.subr.bf16.mxu1 %v415_v62  ;;  %v464_v61 = vld [vmem:[#allocation2 + $0x720] sm:$0xff]  ;;  %v466_v62 = vld [vmem:[#allocation2 + $0x730] sm:$0xff] }
 0x18d   :  { %544 = vmatpush1.bf16.msra.mxu0 %v412_v0  ;;  %626 = vmatpush1.bf16.msra.mxu1 %v414_v3  ;;  %v469_v0 = vld [vmem:[#allocation2 + $0x748] sm:$0xff]  ;;  %v471_v3 = vld [vmem:[#allocation2 + $0x758] sm:$0xff] }
 0x18e   :  { %545 = vmatprep.subr.bf16.mxu0 %v417_v4  ;;  %627 = vmatprep.subr.bf16.mxu1 %v419_v6  ;;  %v468_v4 = vld [vmem:[#allocation2 + $0x740] sm:$0xff]  ;;  %v470_v6 = vld [vmem:[#allocation2 + $0x750] sm:$0xff] }
 0x191   :  { %546 = vmatpush1.bf16.msra.mxu0 %v416_v7  ;;  %628 = vmatpush1.bf16.msra.mxu1 %v418_v8  ;;  %v473_v7 = vld [vmem:[#allocation2 + $0x768] sm:$0xff]  ;;  %v475_v8 = vld [vmem:[#allocation2 + $0x778] sm:$0xff] }
 0x192   :  { %547 = vmatprep.subr.bf16.mxu0 %v421_v9  ;;  %629 = vmatprep.subr.bf16.mxu1 %v423_v10  ;;  %v472_v9 = vld [vmem:[#allocation2 + $0x760] sm:$0xff]  ;;  %v474_v10 = vld [vmem:[#allocation2 + $0x770] sm:$0xff] }
 0x195   :  { %548 = vmatpush1.bf16.msra.mxu0 %v420_v11  ;;  %630 = vmatpush1.bf16.msra.mxu1 %v422_v12  ;;  %v477_v11 = vld [vmem:[#allocation2 + $0x788] sm:$0xff]  ;;  %v479_v12 = vld [vmem:[#allocation2 + $0x798] sm:$0xff] }
 0x196   :  { %549 = vmatprep.subr.bf16.mxu0 %v425_v13  ;;  %631 = vmatprep.subr.bf16.mxu1 %v427_v14  ;;  %v476_v13 = vld [vmem:[#allocation2 + $0x780] sm:$0xff]  ;;  %v478_v14 = vld [vmem:[#allocation2 + $0x790] sm:$0xff] }
 0x199   :  { %550 = vmatpush1.bf16.msra.mxu0 %v424_v15  ;;  %632 = vmatpush1.bf16.msra.mxu1 %v426_v16  ;;  %v481_v15 = vld [vmem:[#allocation2 + $0x7a8] sm:$0xff]  ;;  %v483_v16 = vld [vmem:[#allocation2 + $0x7b8] sm:$0xff] }
 0x19a   :  { %560 = vmatprep.subr.bf16.mxu0 %v429_v17  ;;  %642 = vmatprep.subr.bf16.mxu1 %v431_v18  ;;  %v480_v17 = vld [vmem:[#allocation2 + $0x7a0] sm:$0xff]  ;;  %v482_v18 = vld [vmem:[#allocation2 + $0x7b0] sm:$0xff] }
 0x19c   :  { %552 = vmatmul.mubr.bf16.vlgmr.msra.gmra.mrb[4].mxu0 %v494_v19  ;;  %634 = vmatmul.mubr.bf16.vlgmr.msra.gmra.mrb[4].mxu1 %v494_v19  ;;  %v485_v19 = vld [vmem:[#allocation2 + $0x7c8] sm:$0xff] }
 0x19d   :  { %561 = vmatpush1.bf16.msra.mxu0 %v428_v26  ;;  %643 = vmatpush1.bf16.msra.mxu1 %v430_v27  ;;  %v487_v26 = vld [vmem:[#allocation2 + $0x7d8] sm:$0xff]  ;;  %v484_v27 = vld [vmem:[#allocation2 + $0x7c0] sm:$0xff] }
 0x19e   :  { %562 = vmatprep.subr.bf16.mxu0 %v433_v28  ;;  %644 = vmatprep.subr.bf16.mxu1 %v435_v29  ;;  %v486_v28 = vld [vmem:[#allocation2 + $0x7d0] sm:$0xff]  ;;  %v489_v29 = vld [vmem:[#allocation2 + $0x7e8] sm:$0xff] }
 0x19f   :  { %592 = vmatprep.mubr.bf16.mxu0 %v497_v30  ;;  %674 = vmatprep.mubr.bf16.mxu1 %v497_v30  ;;  %v491_v30 = vld [vmem:[#allocation2 + $0x7f8] sm:$0xff] }
 0x1a1   :  { %563 = vmatpush1.bf16.msra.mxu0 %v432_v31  ;;  %645 = vmatpush1.bf16.msra.mxu1 %v434_v32  ;;  %v488_v31 = vld [vmem:[#allocation2 + $0x7e0] sm:$0xff]  ;;  %v490_v32 = vld [vmem:[#allocation2 + $0x7f0] sm:$0xff] }
 0x1a2   :  { %564 = vmatprep.subr.bf16.mxu0 %v437_v63  ;;  %646 = vmatprep.subr.bf16.mxu1 %v439_v33  ;;  %v496_v63 = vpack.c.bf16 %v2131_v2, %v2131_v2  ;;  %v493_v33 = vld [vmem:[#allocation7 + $0x1] ss:$8 sm:$0xf] }
 0x1a3   :  { %801 = dma.general %s767_s8, 6144, %s2086_s23, %s2003_s27, %s2008_s12, [#allocation17], %s2066_s15, 0   ;;  %v514_v2 = vrot.slane %v493_v33, %v148_v25 }
 0x1a5   :  { %565 = vmatpush1.bf16.msra.mxu0 %v436_v34  ;;  %647 = vmatpush1.bf16.msra.mxu1 %v438_v35  ;;  %v502_v34 = vrot.slane %v493_v33, %v2115_v22  ;;  %v510_v35 = vrot.slane %v493_v33, %v2118_v23 }
 0x1a6   :  { %566 = vmatprep.subr.bf16.mxu0 %v441_v36  ;;  %648 = vmatprep.subr.bf16.mxu1 %v443_v5  ;;  %v506_v36 = vrot.slane %v493_v33, %v2121_v24 }
 0x1a9   :  { %567 = vmatpush1.bf16.msra.mxu0 %v440_v37  ;;  %649 = vmatpush1.bf16.msra.mxu1 %v442_v38 }
 0x1aa   :  { %568 = vmatprep.subr.bf16.mxu0 %v445_v39  ;;  %650 = vmatprep.subr.bf16.mxu1 %v447_v40 }
 0x1ad   :  { %569 = vmatpush1.bf16.msra.mxu0 %v444_v41  ;;  %651 = vmatpush1.bf16.msra.mxu1 %v446_v42 }
 0x1ae   :  { %570 = vmatprep.subr.bf16.mxu0 %v449_v43  ;;  %652 = vmatprep.subr.bf16.mxu1 %v451_v44 }
 0x1b1   :  { %571 = vmatpush1.bf16.msra.mxu0 %v448_v45  ;;  %653 = vmatpush1.bf16.msra.mxu1 %v450_v46 }
 0x1b2   :  { %572 = vmatprep.subr.bf16.mxu0 %v453_v47  ;;  %654 = vmatprep.subr.bf16.mxu1 %v455_v48 }
 0x1b5   :  { %573 = vmatpush1.bf16.msra.mxu0 %v452_v49  ;;  %655 = vmatpush1.bf16.msra.mxu1 %v454_v50 }
 0x1b6   :  { %574 = vmatprep.subr.bf16.mxu0 %v457_v51  ;;  %656 = vmatprep.subr.bf16.mxu1 %v459_v52 }
 0x1b9   :  { %575 = vmatpush1.bf16.msra.mxu0 %v456_v53  ;;  %657 = vmatpush1.bf16.msra.mxu1 %v458_v54 }
 0x1ba   :  { %576 = vmatprep.subr.bf16.mxu0 %v461_v55  ;;  %658 = vmatprep.subr.bf16.mxu1 %v463_v56 }
 0x1bd   :  { %577 = vmatpush1.bf16.msra.mxu0 %v460_v57  ;;  %659 = vmatpush1.bf16.msra.mxu1 %v462_v58 }
 0x1be   :  { %578 = vmatprep.subr.bf16.mxu0 %v465_v59  ;;  %660 = vmatprep.subr.bf16.mxu1 %v467_v60 }
 0x1c1   :  { %579 = vmatpush1.bf16.msra.mxu0 %v464_v61  ;;  %661 = vmatpush1.bf16.msra.mxu1 %v466_v62 }
 0x1c2   :  { %580 = vmatprep.subr.bf16.mxu0 %v469_v0  ;;  %662 = vmatprep.subr.bf16.mxu1 %v471_v3 }
 0x1c5   :  { %581 = vmatpush1.bf16.msra.mxu0 %v468_v4  ;;  %663 = vmatpush1.bf16.msra.mxu1 %v470_v6 }
 0x1c6   :  { %582 = vmatprep.subr.bf16.mxu0 %v473_v7  ;;  %664 = vmatprep.subr.bf16.mxu1 %v475_v8 }
 0x1c9   :  { %583 = vmatpush1.bf16.msra.mxu0 %v472_v9  ;;  %665 = vmatpush1.bf16.msra.mxu1 %v474_v10 }
 0x1ca   :  { %584 = vmatprep.subr.bf16.mxu0 %v477_v11  ;;  %666 = vmatprep.subr.bf16.mxu1 %v479_v12 }
 0x1cd   :  { %585 = vmatpush1.bf16.msra.mxu0 %v476_v13  ;;  %667 = vmatpush1.bf16.msra.mxu1 %v478_v14 }
 0x1ce   :  { %586 = vmatprep.subr.bf16.mxu0 %v481_v15  ;;  %668 = vmatprep.subr.bf16.mxu1 %v483_v16 }
 0x1d1   :  { %587 = vmatpush1.bf16.msra.mxu0 %v480_v17  ;;  %669 = vmatpush1.bf16.msra.mxu1 %v482_v18 }
 0x1d2   :  { %588 = vmatprep.subr.bf16.mxu0 %v485_v19  ;;  %670 = vmatprep.subr.bf16.mxu1 %v487_v26 }
 0x1d5   :  { %589 = vmatpush1.bf16.msra.mxu0 %v484_v27  ;;  %671 = vmatpush1.bf16.msra.mxu1 %v486_v28 }
 0x1d6   :  { %590 = vmatprep.subr.bf16.mxu0 %v489_v29  ;;  %672 = vmatprep.subr.bf16.mxu1 %v491_v30 }
 0x1d9   :  { %591 = vmatpush1.bf16.msra.mxu0 %v488_v31  ;;  %673 = vmatpush1.bf16.msra.mxu1 %v490_v32 }
 0x1dc   :  { %593 = vmatmul.mubr.bf16.vlgmr.msra.gmra.mrb[4].mxu0 %v496_v63  ;;  %675 = vmatmul.mubr.bf16.vlgmr.msra.gmra.mrb[4].mxu1 %v496_v63 }
 0x2af   :  { %v594_v5 = vpop.f32.mrb[4].mxu0  ;;  %v676_v37 = vpop.f32.mrb[4].mxu1 }
 0x2b0   :  { %v1823_v38 = vadd.f32 %v594_v5, %v502_v34  ;;  %v1825_v39 = vadd.f32 %v676_v37, %v510_v35  ;;  %v596_v40 = vpop.f32.mrb[5].mxu0  ;;  %v678_v41 = vpop.f32.mrb[5].mxu1 }
 0x2b1   :  { %v1824_v42 = vadd.f32 %v596_v40, %v506_v36  ;;  %v1826_v43 = vadd.f32 %v678_v41, %v514_v2  ;;  %v598_v44 = vpop.f32.mrb[6].mxu0  ;;  %v680_v45 = vpop.f32.mrb[6].mxu1 }
 0x2b2   :  { %v683_v46 = vmul.f32 0.01, %v1823_v38  ;;  %v685_v47 = vmul.f32 0.01, %v1825_v39  ;;  %v599_v48 = vpop.f32.mrb[7].mxu0  ;;  %v681_v49 = vpop.f32.mrb[7].mxu1 }
 0x2b3   :  { %v684_v50 = vmul.f32 0.01, %v1824_v42  ;;  %v686_v51 = vmul.f32 0.01, %v1826_v43 }
 0x2b4   :  { %v687_v52 = vmax.f32 %v1823_v38, %v683_v46  ;;  %v689_v53 = vmax.f32 %v1825_v39, %v685_v47 }
 0x2b5   :  { %v688_v21 = vmax.f32 %v1824_v42, %v684_v50  ;;  %v690_v25 = vmax.f32 %v1826_v43, %v686_v51 }
 0x2b6   :  { %v691_v54 = vrot.slane %v687_v52, 4  ;;  %v703_v55 = vrot.slane %v689_v53, 4 }
 0x2b7   :  { %v697_v56 = vrot.slane %v688_v21, 4  ;;  %v709_v57 = vrot.slane %v690_v25, 4 }
 0x2b8   :  { %v692_v58 = vadd.f32 %v691_v54, %v687_v52  ;;  %v704_v59 = vadd.f32 %v703_v55, %v689_v53 }
 0x2b9   :  { %v698_v60 = vadd.f32 %v697_v56, %v688_v21  ;;  %v710_v61 = vadd.f32 %v709_v57, %v690_v25 }
 0x2ba   :  { %v693_v62 = vrot.slane %v692_v58, 2  ;;  %v705_v0 = vrot.slane %v704_v59, 2 }
 0x2bb   :  { %v699_v3 = vrot.slane %v698_v60, 2  ;;  %v711_v4 = vrot.slane %v710_v61, 2 }
 0x2bc   :  { %v694_v6 = vadd.f32 %v693_v62, %v692_v58  ;;  %v706_v7 = vadd.f32 %v705_v0, %v704_v59 }
 0x2bd   :  { %v700_v8 = vadd.f32 %v699_v3, %v698_v60  ;;  %v712_v9 = vadd.f32 %v711_v4, %v710_v61 }
 0x2be   :  { %v695_v10 = vrot.slane %v694_v6, 1  ;;  %v707_v11 = vrot.slane %v706_v7, 1 }
 0x2bf   :  { %v701_v12 = vrot.slane %v700_v8, 1  ;;  %v713_v13 = vrot.slane %v712_v9, 1 }
 0x2c0   :  { %v696_v14 = vadd.f32 %v695_v10, %v694_v6  ;;  %v708_v15 = vadd.f32 %v707_v11, %v706_v7 }
 0x2c1   :  { %v702_v16 = vadd.f32 %v701_v12, %v700_v8  ;;  %v714_v17 = vadd.f32 %v713_v13, %v712_v9 }
 0x2c2   :  { %v715_v18 = vmul.f32 0.125, %v696_v14  ;;  %v717_v19 = vmul.f32 0.125, %v708_v15 }
 0x2c3   :  { %v716_v26 = vmul.f32 0.125, %v702_v16  ;;  %v718_v27 = vmul.f32 0.125, %v714_v17 }
 0x2c4   :  { %v719_v28 = vsub.f32 %v687_v52, %v715_v18  ;;  %v721_v29 = vsub.f32 %v689_v53, %v717_v19 }
 0x2c5   :  { %v720_v30 = vsub.f32 %v688_v21, %v716_v26  ;;  %v722_v31 = vsub.f32 %v690_v25, %v718_v27 }
 0x2c6   :  { %v723_v32 = vmul.f32 %v719_v28, %v719_v28  ;;  %v725_v63 = vmul.f32 %v721_v29, %v721_v29 }
 0x2c7   :  { %v724_v33 = vmul.f32 %v720_v30, %v720_v30  ;;  %v726_v34 = vmul.f32 %v722_v31, %v722_v31 }
 0x2c8   :  { %v727_v35 = vrot.slane %v723_v32, 4  ;;  %v739_v36 = vrot.slane %v725_v63, 4 }
 0x2c9   :  { %v733_v2 = vrot.slane %v724_v33, 4  ;;  %v745_v5 = vrot.slane %v726_v34, 4 }
 0x2ca   :  { %v728_v37 = vadd.f32 %v727_v35, %v723_v32  ;;  %v740_v38 = vadd.f32 %v739_v36, %v725_v63 }
 0x2cb   :  { %v734_v39 = vadd.f32 %v733_v2, %v724_v33  ;;  %v746_v40 = vadd.f32 %v745_v5, %v726_v34 }
 0x2cc   :  { %v729_v41 = vrot.slane %v728_v37, 2  ;;  %v741_v42 = vrot.slane %v740_v38, 2 }
 0x2cd   :  { %v735_v43 = vrot.slane %v734_v39, 2  ;;  %v747_v44 = vrot.slane %v746_v40, 2 }
 0x2ce   :  { %v730_v45 = vadd.f32 %v729_v41, %v728_v37  ;;  %v742_v46 = vadd.f32 %v741_v42, %v740_v38 }
 0x2cf   :  { %v736_v47 = vadd.f32 %v735_v43, %v734_v39  ;;  %v748_v48 = vadd.f32 %v747_v44, %v746_v40 }
 0x2d0   :  { %v731_v49 = vrot.slane %v730_v45, 1  ;;  %v743_v50 = vrot.slane %v742_v46, 1 }
 0x2d1   :  { %v737_v51 = vrot.slane %v736_v47, 1  ;;  %v749_v52 = vrot.slane %v748_v48, 1 }
 0x2d2   :  { %v732_v53 = vadd.f32 %v731_v49, %v730_v45  ;;  %v744_v21 = vadd.f32 %v743_v50, %v742_v46 }
 0x2d3   :  { %v738_v25 = vadd.f32 %v737_v51, %v736_v47  ;;  %v750_v54 = vadd.f32 %v749_v52, %v748_v48 }
 0x2d4   :  { %v751_v55 = vmul.f32 0.125, %v732_v53  ;;  %v753_v56 = vmul.f32 0.125, %v744_v21 }
 0x2d5   :  { %v752_v57 = vmul.f32 0.125, %v738_v25  ;;  %v754_v58 = vmul.f32 0.125, %v750_v54 }
 0x2d6   :  { %v755_v59 = vadd.f32 1e-05, %v751_v55  ;;  %v757_v60 = vadd.f32 1e-05, %v753_v56 }
 0x2d7   :  { %v756_v61 = vadd.f32 1e-05, %v752_v57  ;;  %v758_v62 = vadd.f32 1e-05, %v754_v58 }
 0x2d8   :  { %1879 = vrsqrt.f32 %v755_v59 }
 0x2d9   :  { %1881 = vrsqrt.f32 %v757_v60 }
 0x2da   :  { %1883 = vrsqrt.f32 %v756_v61 }
 0x2db   :  { %1885 = vrsqrt.f32 %v758_v62 }
 0x2e2   :  { %v1880_v0 = vpop.eup %1879 }
 0x2e3   :  { %v1882_v3 = vpop.eup %1881  ;;  %v2161_v4 = vmul.f32 %v1880_v0, %v719_v28 }
 0x2e4   :  { %v1884_v6 = vpop.eup %1883  ;;  %v2163_v7 = vmul.f32 %v1882_v3, %v721_v29 }
 0x2e5   :  { %v1886_v8 = vpop.eup %1885  ;;  %v764_v9 = vmul.f32 %v1884_v6, %v720_v30 }
 0x2e6   :  { %v2165_v10 = vmul.f32 %v1886_v8, %v722_v31 }
 0x2e7   :  { %1979 = dma.done.wait [#allocation3], 12288 }
 0x2e8   :  { %1980 = vsyncadd [#allocation3], 4294955008  ;;  %v904_v11 = vpack.c.bf16 %v764_v9, %v764_v9  ;;  %1164 = sst [smem:[#allocation19]] %s1993_s9  ;;  %v806_v12 = vld [vmem:[#allocation2 + $0x8] sm:$0xff]  ;;  %v831_v13 = vld [vmem:[#allocation2 + $0x110] sm:$0xff]  ;;  %v2175_v49 = vpack.c.bf16 %v2161_v4, %v2161_v4  ;;  %v2179_v21 = vpack.c.bf16 %v2165_v10, %v2165_v10  ;;  %s1148_s19 = scalar_lea.hbm %s2269_s1, 20672 }
 0x2e9   :  { %1166 = sst [smem:[#allocation19 + $0x1]] %s1993_s9  ;;  %v805_v14 = vld [vmem:[#allocation2] sm:$0xff]  ;;  %923 = vmatprep.subr.bf16.mxu0 %v806_v12  ;;  %1699 = vmatprep.subr.bf16.mxu1 %v831_v13  ;;  %v807_v15 = vld [vmem:[#allocation2 + $0x10] sm:$0xff]  ;;  %v809_v16 = vld [vmem:[#allocation2 + $0x28] sm:$0xff]  ;;  %s2009_s20 = smov [#allocation18]  }
 0x2ea   :  { %1037 = vmatprep.mubr.bf16.mxu1 %v904_v11  ;;  %955 = vmatprep.mubr.bf16.mxu0 %v904_v11  ;;  %1168 = sst [smem:[#allocation19 + $0x2]] %s1997_s2  ;;  %v834_v17 = vld [vmem:[#allocation2 + $0x130] sm:$0xff]  ;;  %v808_v18 = vld [vmem:[#allocation2 + $0x20] sm:$0xff]  ;;  %v812_v26 = vld [vmem:[#allocation2 + $0x48] sm:$0xff] }
 0x2eb   :  { %1170 = sst [smem:[#allocation19 + $0x3]] %s1998_s14  ;;  %924 = vmatpush1.bf16.msra.mxu0 %v805_v14  ;;  %1700 = vmatpush3.bf16.msra.mxu1 %v807_v15  ;;  %v810_v19 = vld [vmem:[#allocation2 + $0x30] sm:$0xff]  ;;  %v811_v28 = vld [vmem:[#allocation2 + $0x40] sm:$0xff]  ;;  %v815_v30 = vld [vmem:[#allocation2 + $0x68] sm:$0xff] }
 0x2ec   :  { %1172 = sst [smem:[#allocation19 + $0x4]] %s1995_s11  ;;  %925 = vmatprep.subr.bf16.mxu0 %v809_v16  ;;  %1701 = vmatprep.subr.bf16.mxu1 %v834_v17  ;;  %v837_v27 = vld [vmem:[#allocation2 + $0x150] sm:$0xff]  ;;  %v814_v32 = vld [vmem:[#allocation2 + $0x60] sm:$0xff]  ;;  %v818_v33 = vld [vmem:[#allocation2 + $0x88] sm:$0xff] }
 0x2ed   :  { %1174 = sst [smem:[#allocation19 + $0x5]] %s1994_s10  ;;  %v813_v29 = vld [vmem:[#allocation2 + $0x50] sm:$0xff]  ;;  %v817_v35 = vld [vmem:[#allocation2 + $0x80] sm:$0xff]  ;;  %v821_v2 = vld [vmem:[#allocation2 + $0xa8] sm:$0xff] }
 0x2ee   :  { %v840_v31 = vld [vmem:[#allocation2 + $0x170] sm:$0xff]  ;;  %v820_v37 = vld [vmem:[#allocation2 + $0xa0] sm:$0xff]  ;;  %v824_v39 = vld [vmem:[#allocation2 + $0xc8] sm:$0xff] }
 0x2ef   :  { %926 = vmatpush1.bf16.msra.mxu0 %v808_v18  ;;  %1702 = vmatpush3.bf16.msra.mxu1 %v810_v19  ;;  %v816_v63 = vld [vmem:[#allocation2 + $0x70] sm:$0xff]  ;;  %v823_v41 = vld [vmem:[#allocation2 + $0xc0] sm:$0xff]  ;;  %v827_v43 = vld [vmem:[#allocation2 + $0xe8] sm:$0xff] }
 0x2f0   :  { %927 = vmatprep.subr.bf16.mxu0 %v812_v26  ;;  %1703 = vmatprep.subr.bf16.mxu1 %v837_v27  ;;  %v843_v34 = vld [vmem:[#allocation2 + $0x190] sm:$0xff]  ;;  %v826_v45 = vld [vmem:[#allocation2 + $0xe0] sm:$0xff]  ;;  %v830_v47 = vld [vmem:[#allocation2 + $0x108] sm:$0xff]  ;;  %v2185_v27 = vpack.c.bf16 %v2163_v7, %v2163_v7 }
 0x2f1   :  { %v819_v36 = vld [vmem:[#allocation2 + $0x90] sm:$0xff]  ;;  %v829_v50 = vld [vmem:[#allocation2 + $0x100] sm:$0xff]  ;;  %v833_v52 = vld [vmem:[#allocation2 + $0x128] sm:$0xff] }
 0x2f2   :  { %v846_v5 = vld [vmem:[#allocation2 + $0x1b0] sm:$0xff]  ;;  %v832_v25 = vld [vmem:[#allocation2 + $0x120] sm:$0xff]  ;;  %v836_v55 = vld [vmem:[#allocation2 + $0x148] sm:$0xff] }
 0x2f3   :  { %928 = vmatpush1.bf16.msra.mxu0 %v811_v28  ;;  %1704 = vmatpush3.bf16.msra.mxu1 %v813_v29  ;;  %v822_v38 = vld [vmem:[#allocation2 + $0xb0] sm:$0xff]  ;;  %v835_v57 = vld [vmem:[#allocation2 + $0x140] sm:$0xff]  ;;  %v839_v59 = vld [vmem:[#allocation2 + $0x168] sm:$0xff] }
 0x2f4   :  { %929 = vmatprep.subr.bf16.mxu0 %v815_v30  ;;  %1705 = vmatprep.subr.bf16.mxu1 %v840_v31  ;;  %v849_v40 = vld [vmem:[#allocation2 + $0x1d0] sm:$0xff]  ;;  %v838_v61 = vld [vmem:[#allocation2 + $0x160] sm:$0xff]  ;;  %v842_v0 = vld [vmem:[#allocation2 + $0x188] sm:$0xff] }
 0x2f5   :  { %v825_v42 = vld [vmem:[#allocation2 + $0xd0] sm:$0xff]  ;;  %v841_v4 = vld [vmem:[#allocation2 + $0x180] sm:$0xff]  ;;  %v845_v8 = vld [vmem:[#allocation2 + $0x1a8] sm:$0xff] }
 0x2f6   :  { %v852_v44 = vld [vmem:[#allocation2 + $0x1f0] sm:$0xff]  ;;  %v844_v10 = vld [vmem:[#allocation2 + $0x1a0] sm:$0xff]  ;;  %v848_v12 = vld [vmem:[#allocation2 + $0x1c8] sm:$0xff] }
 0x2f7   :  { %930 = vmatpush1.bf16.msra.mxu0 %v814_v32  ;;  %1706 = vmatpush3.bf16.msra.mxu1 %v816_v63  ;;  %v828_v46 = vld [vmem:[#allocation2 + $0xf0] sm:$0xff]  ;;  %v847_v14 = vld [vmem:[#allocation2 + $0x1c0] sm:$0xff]  ;;  %v851_v16 = vld [vmem:[#allocation2 + $0x1e8] sm:$0xff] }
 0x2f8   :  { %931 = vmatprep.subr.bf16.mxu0 %v818_v33  ;;  %1707 = vmatprep.subr.bf16.mxu1 %v843_v34  ;;  %v879_v48 = vld [vmem:[#allocation2 + $0x310] sm:$0xff]  ;;  %v850_v18 = vld [vmem:[#allocation2 + $0x1e0] sm:$0xff]  ;;  %v854_v26 = vld [vmem:[#allocation2 + $0x208] sm:$0xff] }
 0x2f9   :  { %v855_v51 = vld [vmem:[#allocation2 + $0x210] sm:$0xff]  ;;  %v853_v28 = vld [vmem:[#allocation2 + $0x200] sm:$0xff]  ;;  %v857_v29 = vld [vmem:[#allocation2 + $0x228] sm:$0xff] }
 0x2fa   :  { %v882_v53 = vld [vmem:[#allocation2 + $0x330] sm:$0xff]  ;;  %v856_v30 = vld [vmem:[#allocation2 + $0x220] sm:$0xff]  ;;  %v860_v31 = vld [vmem:[#allocation2 + $0x248] sm:$0xff] }
 0x2fb   :  { %932 = vmatpush1.bf16.msra.mxu0 %v817_v35  ;;  %1708 = vmatpush3.bf16.msra.mxu1 %v819_v36  ;;  %v858_v54 = vld [vmem:[#allocation2 + $0x230] sm:$0xff]  ;;  %v859_v32 = vld [vmem:[#allocation2 + $0x240] sm:$0xff]  ;;  %v863_v7 = vld [vmem:[#allocation2 + $0x268] sm:$0xff] }
 0x2fc   :  { %933 = vmatprep.subr.bf16.mxu0 %v821_v2  ;;  %1709 = vmatprep.subr.bf16.mxu1 %v846_v5  ;;  %v885_v56 = vld [vmem:[#allocation2 + $0x350] sm:$0xff]  ;;  %v862_v63 = vld [vmem:[#allocation2 + $0x260] sm:$0xff]  ;;  %v866_v33 = vld [vmem:[#allocation2 + $0x288] sm:$0xff] }
 0x2fd   :  { %v861_v58 = vld [vmem:[#allocation2 + $0x250] sm:$0xff]  ;;  %v865_v34 = vld [vmem:[#allocation2 + $0x280] sm:$0xff]  ;;  %v869_v35 = vld [vmem:[#allocation2 + $0x2a8] sm:$0xff] }
 0x2fe   :  { %v888_v60 = vld [vmem:[#allocation2 + $0x370] sm:$0xff]  ;;  %v868_v36 = vld [vmem:[#allocation2 + $0x2a0] sm:$0xff]  ;;  %v872_v2 = vld [vmem:[#allocation2 + $0x2c8] sm:$0xff] }
 0x2ff   :  { %934 = vmatpush1.bf16.msra.mxu0 %v820_v37  ;;  %1710 = vmatpush3.bf16.msra.mxu1 %v822_v38  ;;  %v864_v62 = vld [vmem:[#allocation2 + $0x270] sm:$0xff]  ;;  %v871_v5 = vld [vmem:[#allocation2 + $0x2c0] sm:$0xff]  ;;  %v875_v37 = vld [vmem:[#allocation2 + $0x2e8] sm:$0xff] }
 0x300   :  { %935 = vmatprep.subr.bf16.mxu0 %v824_v39  ;;  %1711 = vmatprep.subr.bf16.mxu1 %v849_v40  ;;  %v891_v3 = vld [vmem:[#allocation2 + $0x390] sm:$0xff]  ;;  %v874_v38 = vld [vmem:[#allocation2 + $0x2e0] sm:$0xff]  ;;  %v878_v39 = vld [vmem:[#allocation2 + $0x308] sm:$0xff] }
 0x301   :  { %v867_v6 = vld [vmem:[#allocation2 + $0x290] sm:$0xff]  ;;  %v877_v40 = vld [vmem:[#allocation2 + $0x300] sm:$0xff] }
 0x302   :  { %v894_v9 = vld [vmem:[#allocation2 + $0x3b0] sm:$0xff] }
 0x303   :  { %936 = vmatpush1.bf16.msra.mxu0 %v823_v41  ;;  %1712 = vmatpush3.bf16.msra.mxu1 %v825_v42  ;;  %v870_v11 = vld [vmem:[#allocation2 + $0x2b0] sm:$0xff]  ;;  %v881_v41 = vld [vmem:[#allocation2 + $0x328] sm:$0xff]  ;;  %v880_v42 = vld [vmem:[#allocation2 + $0x320] sm:$0xff] }
 0x304   :  { %937 = vmatprep.subr.bf16.mxu0 %v827_v43  ;;  %1713 = vmatprep.subr.bf16.mxu1 %v852_v44  ;;  %v897_v13 = vld [vmem:[#allocation2 + $0x3d0] sm:$0xff]  ;;  %v884_v43 = vld [vmem:[#allocation2 + $0x348] sm:$0xff]  ;;  %v883_v44 = vld [vmem:[#allocation2 + $0x340] sm:$0xff] }
 0x305   :  { %v873_v15 = vld [vmem:[#allocation2 + $0x2d0] sm:$0xff] }
 0x306   :  { %v900_v17 = vld [vmem:[#allocation2 + $0x3f0] sm:$0xff] }
 0x307   :  { %938 = vmatpush1.bf16.msra.mxu0 %v826_v45  ;;  %1714 = vmatpush3.bf16.msra.mxu1 %v828_v46  ;;  %v876_v19 = vld [vmem:[#allocation2 + $0x2f0] sm:$0xff]  ;;  %v887_v45 = vld [vmem:[#allocation2 + $0x368] sm:$0xff]  ;;  %v886_v46 = vld [vmem:[#allocation2 + $0x360] sm:$0xff] }
 0x308   :  { %939 = vmatprep.subr.bf16.mxu0 %v830_v47  ;;  %1721 = vmatprep.subr.bf16.mxu1 %v879_v48  ;;  %v890_v47 = vld [vmem:[#allocation2 + $0x388] sm:$0xff]  ;;  %v889_v48 = vld [vmem:[#allocation2 + $0x380] sm:$0xff] }
 0x30a   :  { %1038 = vmatmul.mubr.bf16.vlgmr.msra.gmra.mrb[8].mxu1 %v2175_v49 }
 0x30b   :  { %940 = vmatpush1.bf16.msra.mxu0 %v829_v50  ;;  %1722 = vmatpush3.bf16.msra.mxu1 %v855_v51  ;;  %v892_v50 = vld [vmem:[#allocation2 + $0x3a0] sm:$0xff]  ;;  %v896_v51 = vld [vmem:[#allocation2 + $0x3c8] sm:$0xff] }
 0x30c   :  { %941 = vmatprep.subr.bf16.mxu0 %v833_v52  ;;  %1723 = vmatprep.subr.bf16.mxu1 %v882_v53  ;;  %v895_v52 = vld [vmem:[#allocation2 + $0x3c0] sm:$0xff]  ;;  %v899_v53 = vld [vmem:[#allocation2 + $0x3e8] sm:$0xff] }
 0x30d   :  { %1077 = vmatprep.mubr.bf16.mxu1 %v2179_v21 }
 0x30f   :  { %942 = vmatpush1.bf16.msra.mxu0 %v832_v25  ;;  %1724 = vmatpush3.bf16.msra.mxu1 %v858_v54 }
 0x310   :  { %943 = vmatprep.subr.bf16.mxu0 %v836_v55  ;;  %1725 = vmatprep.subr.bf16.mxu1 %v885_v56 }
 0x313   :  { %944 = vmatpush1.bf16.msra.mxu0 %v835_v57  ;;  %1726 = vmatpush3.bf16.msra.mxu1 %v861_v58  ;;  %v902_v58 = vld [vmem:[#allocation7 + $0x2] ss:$8 sm:$0x7] }
 0x314   :  { %945 = vmatprep.subr.bf16.mxu0 %v839_v59  ;;  %1727 = vmatprep.subr.bf16.mxu1 %v888_v60  ;;  %v919_v59 = vrot.slane %v902_v58, %v2118_v23 }
 0x317   :  { %946 = vmatpush1.bf16.msra.mxu0 %v838_v61  ;;  %1728 = vmatpush3.bf16.msra.mxu1 %v864_v62 }
 0x318   :  { %947 = vmatprep.subr.bf16.mxu0 %v842_v0  ;;  %1729 = vmatprep.subr.bf16.mxu1 %v891_v3 }
 0x31b   :  { %948 = vmatpush1.bf16.msra.mxu0 %v841_v4  ;;  %1730 = vmatpush3.bf16.msra.mxu1 %v867_v6 }
 0x31c   :  { %949 = vmatprep.subr.bf16.mxu0 %v845_v8  ;;  %1731 = vmatprep.subr.bf16.mxu1 %v894_v9 }
 0x31f   :  { %950 = vmatpush1.bf16.msra.mxu0 %v844_v10  ;;  %1732 = vmatpush3.bf16.msra.mxu1 %v870_v11 }
 0x320   :  { %951 = vmatprep.subr.bf16.mxu0 %v848_v12  ;;  %1733 = vmatprep.subr.bf16.mxu1 %v897_v13 }
 0x323   :  { %952 = vmatpush1.bf16.msra.mxu0 %v847_v14  ;;  %1734 = vmatpush3.bf16.msra.mxu1 %v873_v15 }
 0x324   :  { %953 = vmatprep.subr.bf16.mxu0 %v851_v16  ;;  %1735 = vmatprep.subr.bf16.mxu1 %v900_v17 }
 0x327   :  { %954 = vmatpush1.bf16.msra.mxu0 %v850_v18  ;;  %1736 = vmatpush3.bf16.msra.mxu1 %v876_v19 }
 0x328   :  { %964 = vmatprep.subr.bf16.mxu0 %v854_v26 }
 0x32a   :  { %1078 = vmatmul.mubr.bf16.vlgmr.msra.gmra.mrb[12].mxu1 %v2185_v27  ;;  %956 = vmatmul.mubr.bf16.vlgmr.msra.gmra.mrb[8].mxu0 %v2175_v49  ;;  %v893_v49 = vld [vmem:[#allocation2 + $0x3a8] sm:$0xff] }
 0x32b   :  { %965 = vmatpush1.bf16.msra.mxu0 %v853_v28  ;;  %996 = vmatprep.mubr.bf16.mxu0 %v2179_v21  ;;  %v898_v21 = vld [vmem:[#allocation2 + $0x3e0] sm:$0xff] }
 0x32c   :  { %966 = vmatprep.subr.bf16.mxu0 %v857_v29  ;;  %1176 = dma.general %s1148_s19, 2048, %s2070_s17, %s2000_s18, %s2009_s20, [#allocation19], %s2066_s15, 0  }
 0x32f   :  { %967 = vmatpush1.bf16.msra.mxu0 %v856_v30 }
 0x330   :  { %968 = vmatprep.subr.bf16.mxu0 %v860_v31 }
 0x333   :  { %969 = vmatpush1.bf16.msra.mxu0 %v859_v32 }
 0x334   :  { %970 = vmatprep.subr.bf16.mxu0 %v863_v7 }
 0x337   :  { %971 = vmatpush1.bf16.msra.mxu0 %v862_v63  ;;  %v911_v63 = vrot.slane %v902_v58, %v2115_v22 }
 0x338   :  { %972 = vmatprep.subr.bf16.mxu0 %v866_v33  ;;  %v915_v33 = vrot.slane %v902_v58, %v2121_v24 }
 0x33b   :  { %973 = vmatpush1.bf16.msra.mxu0 %v865_v34 }
 0x33c   :  { %974 = vmatprep.subr.bf16.mxu0 %v869_v35 }
 0x33f   :  { %975 = vmatpush1.bf16.msra.mxu0 %v868_v36 }
 0x340   :  { %976 = vmatprep.subr.bf16.mxu0 %v872_v2 }
 0x343   :  { %977 = vmatpush1.bf16.msra.mxu0 %v871_v5 }
 0x344   :  { %978 = vmatprep.subr.bf16.mxu0 %v875_v37 }
 0x347   :  { %979 = vmatpush1.bf16.msra.mxu0 %v874_v38 }
 0x348   :  { %980 = vmatprep.subr.bf16.mxu0 %v878_v39 }
 0x34b   :  { %981 = vmatpush1.bf16.msra.mxu0 %v877_v40 }
 0x34c   :  { %982 = vmatprep.subr.bf16.mxu0 %v881_v41 }
 0x34f   :  { %983 = vmatpush1.bf16.msra.mxu0 %v880_v42 }
 0x350   :  { %984 = vmatprep.subr.bf16.mxu0 %v884_v43 }
 0x353   :  { %985 = vmatpush1.bf16.msra.mxu0 %v883_v44 }
 0x354   :  { %986 = vmatprep.subr.bf16.mxu0 %v887_v45 }
 0x357   :  { %987 = vmatpush1.bf16.msra.mxu0 %v886_v46 }
 0x358   :  { %988 = vmatprep.subr.bf16.mxu0 %v890_v47 }
 0x35b   :  { %989 = vmatpush1.bf16.msra.mxu0 %v889_v48 }
 0x35c   :  { %990 = vmatprep.subr.bf16.mxu0 %v893_v49 }
 0x35f   :  { %991 = vmatpush1.bf16.msra.mxu0 %v892_v50 }
 0x360   :  { %992 = vmatprep.subr.bf16.mxu0 %v896_v51 }
 0x363   :  { %993 = vmatpush1.bf16.msra.mxu0 %v895_v52 }
 0x364   :  { %994 = vmatprep.subr.bf16.mxu0 %v899_v53 }
 0x367   :  { %995 = vmatpush1.bf16.msra.mxu0 %v898_v21 }
 0x36a   :  { %997 = vmatmul.mubr.bf16.vlgmr.msra.gmra.mrb[8].mxu0 %v2185_v27 }
 0x3dd   :  { %v1715_v25 = vpop.f32.mrb[8].mxu1 }
 0x3de   :  { %v1716_v54 = vpop.f32.mrb[9].mxu1 }
 0x3df   :  { %v1717_v55 = vadd.f32 %v1716_v54, %v1715_v25  ;;  %v1718_v56 = vpop.f32.mrb[10].mxu1 }
 0x3e0   :  { %v1719_v57 = vpop.f32.mrb[11].mxu1 }
 0x3e1   :  { %v1040_v60 = vadd.f32 %v1717_v55, %v919_v59 }
 0x3fd   :  { %v1737_v61 = vpop.f32.mrb[12].mxu1 }
 0x3fe   :  { %v1738_v62 = vpop.f32.mrb[13].mxu1 }
 0x3ff   :  { %v1739_v0 = vadd.f32 %v1738_v62, %v1737_v61  ;;  %v1740_v3 = vpop.f32.mrb[14].mxu1 }
 0x400   :  { %v1741_v4 = vpop.f32.mrb[15].mxu1 }
 0x401   :  { %v1080_v6 = vadd.f32 %v1739_v0, %v1040_v60 }
 0x403   :  { %v1087_v8 = vmul.f32 0.01, %v1080_v6 }
 0x405   :  { %v1090_v9 = vmax.f32 %v1080_v6, %v1087_v8 }
 0x407   :  { %v1103_v10 = vrot.slane %v1090_v9, 4 }
 0x409   :  { %v1104_v11 = vadd.f32 %v1103_v10, %v1090_v9 }
 0x40b   :  { %v1105_v12 = vrot.slane %v1104_v11, 2 }
 0x40d   :  { %v1106_v13 = vadd.f32 %v1105_v12, %v1104_v11 }
 0x40f   :  { %v1107_v14 = vrot.slane %v1106_v13, 1 }
 0x411   :  { %v1108_v15 = vadd.f32 %v1107_v14, %v1106_v13 }
 0x413   :  { %v1111_v16 = vmul.f32 0.125, %v1108_v15 }
 0x415   :  { %v1114_v17 = vsub.f32 %v1090_v9, %v1111_v16 }
 0x417   :  { %v1117_v18 = vmul.f32 %v1114_v17, %v1114_v17 }
 0x419   :  { %v1130_v19 = vrot.slane %v1117_v18, 4 }
 0x41b   :  { %v1131_v23 = vadd.f32 %v1130_v19, %v1117_v18 }
 0x41d   :  { %v1132_v26 = vrot.slane %v1131_v23, 2 }
 0x41f   :  { %v1133_v27 = vadd.f32 %v1132_v26, %v1131_v23 }
 0x421   :  { %v1134_v28 = vrot.slane %v1133_v27, 1 }
 0x423   :  { %v1135_v29 = vadd.f32 %v1134_v28, %v1133_v27 }
 0x425   :  { %v1138_v30 = vmul.f32 0.125, %v1135_v29 }
 0x427   :  { %v1141_v31 = vadd.f32 1e-05, %v1138_v30 }
 0x429   :  { %1887 = vrsqrt.f32 %v1141_v31 }
 0x433   :  { %v1888_v32 = vpop.eup %1887 }
 0x434   :  { %v2198_v7 = vmul.f32 %v1888_v32, %v1114_v17 }
 0x43d   :  { %v998_v34 = vpop.f32.mrb[8].mxu0 }
 0x43e   :  { %v1827_v35 = vadd.f32 %v998_v34, %v911_v63  ;;  %v1000_v36 = vpop.f32.mrb[9].mxu0 }
 0x43f   :  { %v1828_v2 = vadd.f32 %v1000_v36, %v915_v33  ;;  %v1002_v5 = vpop.f32.mrb[10].mxu0 }
 0x440   :  { %v1085_v37 = vmul.f32 0.01, %v1827_v35  ;;  %v1003_v38 = vpop.f32.mrb[11].mxu0 }
 0x441   :  { %v1086_v39 = vmul.f32 0.01, %v1828_v2 }
 0x442   :  { %v1088_v40 = vmax.f32 %v1827_v35, %v1085_v37 }
 0x443   :  { %v1089_v41 = vmax.f32 %v1828_v2, %v1086_v39 }
 0x444   :  { %v1091_v42 = vrot.slane %v1088_v40, 4 }
 0x445   :  { %v1097_v43 = vrot.slane %v1089_v41, 4 }
 0x446   :  { %v1092_v44 = vadd.f32 %v1091_v42, %v1088_v40 }
 0x447   :  { %v1098_v45 = vadd.f32 %v1097_v43, %v1089_v41 }
 0x448   :  { %v1093_v46 = vrot.slane %v1092_v44, 2 }
 0x449   :  { %v1099_v47 = vrot.slane %v1098_v45, 2 }
 0x44a   :  { %v1094_v48 = vadd.f32 %v1093_v46, %v1092_v44 }
 0x44b   :  { %v1100_v49 = vadd.f32 %v1099_v47, %v1098_v45 }
 0x44c   :  { %v1095_v50 = vrot.slane %v1094_v48, 1 }
 0x44d   :  { %v1101_v51 = vrot.slane %v1100_v49, 1 }
 0x44e   :  { %v1096_v52 = vadd.f32 %v1095_v50, %v1094_v48 }
 0x44f   :  { %v1102_v53 = vadd.f32 %v1101_v51, %v1100_v49 }
 0x450   :  { %v1109_v21 = vmul.f32 0.125, %v1096_v52 }
 0x451   :  { %v1110_v25 = vmul.f32 0.125, %v1102_v53 }
 0x452   :  { %v1112_v54 = vsub.f32 %v1088_v40, %v1109_v21 }
 0x453   :  { %v1113_v55 = vsub.f32 %v1089_v41, %v1110_v25 }
 0x454   :  { %v1115_v56 = vmul.f32 %v1112_v54, %v1112_v54 }
 0x455   :  { %v1116_v57 = vmul.f32 %v1113_v55, %v1113_v55 }
 0x456   :  { %v1118_v58 = vrot.slane %v1115_v56, 4 }
 0x457   :  { %v1124_v59 = vrot.slane %v1116_v57, 4 }
 0x458   :  { %v1119_v60 = vadd.f32 %v1118_v58, %v1115_v56 }
 0x459   :  { %v1125_v61 = vadd.f32 %v1124_v59, %v1116_v57 }
 0x45a   :  { %v1120_v62 = vrot.slane %v1119_v60, 2 }
 0x45b   :  { %v1126_v0 = vrot.slane %v1125_v61, 2 }
 0x45c   :  { %v1121_v3 = vadd.f32 %v1120_v62, %v1119_v60 }
 0x45d   :  { %v1127_v4 = vadd.f32 %v1126_v0, %v1125_v61 }
 0x45e   :  { %v1122_v6 = vrot.slane %v1121_v3, 1 }
 0x45f   :  { %v1128_v8 = vrot.slane %v1127_v4, 1 }
 0x460   :  { %v1123_v9 = vadd.f32 %v1122_v6, %v1121_v3 }
 0x461   :  { %v1129_v10 = vadd.f32 %v1128_v8, %v1127_v4 }
 0x462   :  { %v1136_v11 = vmul.f32 0.125, %v1123_v9 }
 0x463   :  { %v1137_v12 = vmul.f32 0.125, %v1129_v10 }
 0x464   :  { %v1139_v13 = vadd.f32 1e-05, %v1136_v11 }
 0x465   :  { %v1140_v14 = vadd.f32 1e-05, %v1137_v12 }
 0x466   :  { %1889 = vrsqrt.f32 %v1139_v13 }
 0x467   :  { %1891 = vrsqrt.f32 %v1140_v14 }
 0x470   :  { %v1890_v15 = vpop.eup %1889 }
 0x471   :  { %v1892_v16 = vpop.eup %1891  ;;  %v2202_v17 = vmul.f32 %v1890_v15, %v1112_v54 }
 0x472   :  { %v1146_v18 = vmul.f32 %v1892_v16, %v1113_v55 }
 0x473   :  { %1981 = dma.done.wait [#allocation3 + $0x1], 6144 }
 0x474   :  { %1982 = vsyncadd [#allocation3 + $0x1], 4294961152  ;;  %v1232_v19 = vpack.c.bf16 %v1146_v18, %v1146_v18  ;;  %1385 = sst [smem:[#allocation21]] %s1993_s9  ;;  %v1182_v23 = vld [vmem:[#allocation2 + $0x408] sm:$0xff]  ;;  %v1181_v26 = vld [vmem:[#allocation2 + $0x400] sm:$0xff]  ;;  %v1231_v25 = vpack.c.bf16 %v2202_v17, %v2202_v17  ;;  %v1233_v9 = vpack.c.bf16 %v2198_v7, %v2198_v7  ;;  %s1369_s24 = scalar_lea.hbm %s2269_s1, 36992 }
 0x475   :  { %1387 = sst [smem:[#allocation21 + $0x1]] %s1993_s9  ;;  %v1184_v27 = vld [vmem:[#allocation2 + $0x428] sm:$0xff]  ;;  %1245 = vmatprep.subr.bf16.mxu1 %v1182_v23  ;;  %v1183_v28 = vld [vmem:[#allocation2 + $0x420] sm:$0xff]  ;;  %s2010_s25 = smov [#allocation20]  }
 0x476   :  { %1277 = vmatprep.mubr.bf16.mxu1 %v1232_v19  ;;  %1389 = sst [smem:[#allocation21 + $0x2]] %s1997_s2  ;;  %1246 = vmatpush1.bf16.msra.mxu1 %v1181_v26  ;;  %v1186_v29 = vld [vmem:[#allocation2 + $0x448] sm:$0xff]  ;;  %v1185_v30 = vld [vmem:[#allocation2 + $0x440] sm:$0xff] }
 0x477   :  { %1391 = sst [smem:[#allocation21 + $0x3]] %s1998_s14  ;;  %1247 = vmatprep.subr.bf16.mxu1 %v1184_v27  ;;  %v1188_v31 = vld [vmem:[#allocation2 + $0x468] sm:$0xff]  ;;  %v1187_v32 = vld [vmem:[#allocation2 + $0x460] sm:$0xff] }
 0x478   :  { %1393 = sst [smem:[#allocation21 + $0x4]] %s1995_s11  ;;  %v1190_v63 = vld [vmem:[#allocation2 + $0x488] sm:$0xff]  ;;  %v1189_v33 = vld [vmem:[#allocation2 + $0x480] sm:$0xff] }
 0x479   :  { %1395 = sst [smem:[#allocation21 + $0x5]] %s1994_s10  ;;  %v1192_v34 = vld [vmem:[#allocation2 + $0x4a8] sm:$0xff]  ;;  %v1191_v35 = vld [vmem:[#allocation2 + $0x4a0] sm:$0xff] }
 0x47a   :  { %1248 = vmatpush1.bf16.msra.mxu1 %v1183_v28  ;;  %v1194_v36 = vld [vmem:[#allocation2 + $0x4c8] sm:$0xff]  ;;  %v1193_v2 = vld [vmem:[#allocation2 + $0x4c0] sm:$0xff] }
 0x47b   :  { %1249 = vmatprep.subr.bf16.mxu1 %v1186_v29  ;;  %v1196_v5 = vld [vmem:[#allocation2 + $0x4e8] sm:$0xff]  ;;  %v1195_v37 = vld [vmem:[#allocation2 + $0x4e0] sm:$0xff] }
 0x47c   :  { %v1198_v38 = vld [vmem:[#allocation2 + $0x508] sm:$0xff]  ;;  %v1197_v39 = vld [vmem:[#allocation2 + $0x500] sm:$0xff] }
 0x47d   :  { %v1200_v40 = vld [vmem:[#allocation2 + $0x528] sm:$0xff]  ;;  %v1199_v41 = vld [vmem:[#allocation2 + $0x520] sm:$0xff] }
 0x47e   :  { %1250 = vmatpush1.bf16.msra.mxu1 %v1185_v30  ;;  %v1202_v42 = vld [vmem:[#allocation2 + $0x548] sm:$0xff]  ;;  %v1201_v43 = vld [vmem:[#allocation2 + $0x540] sm:$0xff] }
 0x47f   :  { %1251 = vmatprep.subr.bf16.mxu1 %v1188_v31  ;;  %v1204_v44 = vld [vmem:[#allocation2 + $0x568] sm:$0xff]  ;;  %v1203_v45 = vld [vmem:[#allocation2 + $0x560] sm:$0xff] }
 0x480   :  { %v1206_v46 = vld [vmem:[#allocation2 + $0x588] sm:$0xff]  ;;  %v1205_v47 = vld [vmem:[#allocation2 + $0x580] sm:$0xff] }
 0x481   :  { %v1208_v48 = vld [vmem:[#allocation2 + $0x5a8] sm:$0xff]  ;;  %v1207_v49 = vld [vmem:[#allocation2 + $0x5a0] sm:$0xff] }
 0x482   :  { %1252 = vmatpush1.bf16.msra.mxu1 %v1187_v32  ;;  %v1210_v50 = vld [vmem:[#allocation2 + $0x5c8] sm:$0xff]  ;;  %v1209_v51 = vld [vmem:[#allocation2 + $0x5c0] sm:$0xff] }
 0x483   :  { %1253 = vmatprep.subr.bf16.mxu1 %v1190_v63  ;;  %v1212_v52 = vld [vmem:[#allocation2 + $0x5e8] sm:$0xff]  ;;  %v1211_v53 = vld [vmem:[#allocation2 + $0x5e0] sm:$0xff] }
 0x484   :  { %v1214_v21 = vld [vmem:[#allocation2 + $0x608] sm:$0xff]  ;;  %v1213_v54 = vld [vmem:[#allocation2 + $0x600] sm:$0xff] }
 0x485   :  { %v1216_v55 = vld [vmem:[#allocation2 + $0x628] sm:$0xff]  ;;  %v1215_v56 = vld [vmem:[#allocation2 + $0x620] sm:$0xff] }
 0x486   :  { %1254 = vmatpush1.bf16.msra.mxu1 %v1189_v33  ;;  %v1218_v57 = vld [vmem:[#allocation2 + $0x648] sm:$0xff]  ;;  %v1217_v58 = vld [vmem:[#allocation2 + $0x640] sm:$0xff] }
 0x487   :  { %1255 = vmatprep.subr.bf16.mxu1 %v1192_v34  ;;  %v1220_v59 = vld [vmem:[#allocation2 + $0x668] sm:$0xff]  ;;  %v1219_v60 = vld [vmem:[#allocation2 + $0x660] sm:$0xff] }
 0x488   :  { %v1222_v61 = vld [vmem:[#allocation2 + $0x688] sm:$0xff]  ;;  %v1221_v62 = vld [vmem:[#allocation2 + $0x680] sm:$0xff] }
 0x489   :  { %v1224_v0 = vld [vmem:[#allocation2 + $0x6a8] sm:$0xff]  ;;  %v1225_v4 = vld [vmem:[#allocation2 + $0x6c0] sm:$0xff] }
 0x48a   :  { %1256 = vmatpush1.bf16.msra.mxu1 %v1191_v35  ;;  %v1226_v3 = vld [vmem:[#allocation2 + $0x6c8] sm:$0xff]  ;;  %v1227_v8 = vld [vmem:[#allocation2 + $0x6e0] sm:$0xff] }
 0x48b   :  { %1257 = vmatprep.subr.bf16.mxu1 %v1194_v36  ;;  %v1228_v6 = vld [vmem:[#allocation2 + $0x6e8] sm:$0xff] }
 0x48c   :  { %v1230_v10 = vld [vmem:[#allocation7 + $0x3] ss:$8 sm:$0x3] }
 0x48d   :  { %v1238_v11 = vrot.slane %v1230_v10, %v2115_v22  ;;  %v1242_v12 = vrot.slane %v1230_v10, %v2121_v24 }
 0x48e   :  { %1258 = vmatpush1.bf16.msra.mxu1 %v1193_v2 }
 0x48f   :  { %1259 = vmatprep.subr.bf16.mxu1 %v1196_v5 }
 0x492   :  { %1260 = vmatpush1.bf16.msra.mxu1 %v1195_v37 }
 0x493   :  { %1261 = vmatprep.subr.bf16.mxu1 %v1198_v38 }
 0x496   :  { %1262 = vmatpush1.bf16.msra.mxu1 %v1197_v39 }
 0x497   :  { %1263 = vmatprep.subr.bf16.mxu1 %v1200_v40 }
 0x49a   :  { %1264 = vmatpush1.bf16.msra.mxu1 %v1199_v41 }
 0x49b   :  { %1265 = vmatprep.subr.bf16.mxu1 %v1202_v42 }
 0x49e   :  { %1266 = vmatpush1.bf16.msra.mxu1 %v1201_v43 }
 0x49f   :  { %1267 = vmatprep.subr.bf16.mxu1 %v1204_v44 }
 0x4a2   :  { %1268 = vmatpush1.bf16.msra.mxu1 %v1203_v45 }
 0x4a3   :  { %1269 = vmatprep.subr.bf16.mxu1 %v1206_v46 }
 0x4a6   :  { %1270 = vmatpush1.bf16.msra.mxu1 %v1205_v47 }
 0x4a7   :  { %1271 = vmatprep.subr.bf16.mxu1 %v1208_v48 }
 0x4aa   :  { %1272 = vmatpush1.bf16.msra.mxu1 %v1207_v49 }
 0x4ab   :  { %1273 = vmatprep.subr.bf16.mxu1 %v1210_v50 }
 0x4ae   :  { %1274 = vmatpush1.bf16.msra.mxu1 %v1209_v51 }
 0x4af   :  { %1275 = vmatprep.subr.bf16.mxu1 %v1212_v52 }
 0x4b2   :  { %1276 = vmatpush1.bf16.msra.mxu1 %v1211_v53 }
 0x4b3   :  { %1286 = vmatprep.subr.bf16.mxu1 %v1214_v21 }
 0x4b5   :  { %1278 = vmatmul.mubr.bf16.vlgmr.msra.gmra.mrb[16].mxu1 %v1231_v25 }
 0x4b6   :  { %1287 = vmatpush1.bf16.msra.mxu1 %v1213_v54  ;;  %1318 = vmatprep.mubr.bf16.mxu1 %v2005_v1  ;;  %v1223_v1 = vld [vmem:[#allocation2 + $0x6a0] sm:$0xff] }
 0x4b7   :  { %1288 = vmatprep.subr.bf16.mxu1 %v1216_v55  ;;  %1397 = dma.general %s1369_s24, 1024, %s2086_s23, %s2003_s27, %s2010_s25, [#allocation21], %s2066_s15, 0  }
 0x4ba   :  { %1289 = vmatpush1.bf16.msra.mxu1 %v1215_v56 }
 0x4bb   :  { %1290 = vmatprep.subr.bf16.mxu1 %v1218_v57 }
 0x4be   :  { %1291 = vmatpush1.bf16.msra.mxu1 %v1217_v58 }
 0x4bf   :  { %1292 = vmatprep.subr.bf16.mxu1 %v1220_v59 }
 0x4c2   :  { %1293 = vmatpush1.bf16.msra.mxu1 %v1219_v60 }
 0x4c3   :  { %1294 = vmatprep.subr.bf16.mxu1 %v1222_v61 }
 0x4c6   :  { %1295 = vmatpush1.bf16.msra.mxu1 %v1221_v62 }
 0x4c7   :  { %1296 = vmatprep.subr.bf16.mxu1 %v1224_v0 }
 0x4ca   :  { %1297 = vmatpush1.bf16.msra.mxu1 %v1223_v1 }
 0x4cb   :  { %1298 = vmatprep.subr.bf16.mxu1 %v1226_v3 }
 0x4ce   :  { %1299 = vmatpush1.bf16.msra.mxu1 %v1225_v4 }
 0x4cf   :  { %1300 = vmatprep.subr.bf16.mxu1 %v1228_v6 }
 0x4d2   :  { %1301 = vmatpush1.bf16.msra.mxu1 %v1227_v8 }
 0x4d5   :  { %1319 = vmatmul.mubr.bf16.vlgmr.msra.gmra.mrb[16].mxu1 %v1233_v9 }
 0x5a8   :  { %v1320_v13 = vpop.f32.mrb[16].mxu1 }
 0x5a9   :  { %v1829_v14 = vadd.f32 %v1320_v13, %v1238_v11  ;;  %v1322_v15 = vpop.f32.mrb[17].mxu1 }
 0x5aa   :  { %v1830_v16 = vadd.f32 %v1322_v15, %v1242_v12  ;;  %v1324_v17 = vpop.f32.mrb[18].mxu1 }
 0x5ab   :  { %v1327_v7 = vmul.f32 0.01, %v1829_v14  ;;  %v1325_v18 = vpop.f32.mrb[19].mxu1 }
 0x5ac   :  { %v1328_v19 = vmul.f32 0.01, %v1830_v16 }
 0x5ad   :  { %v1329_v23 = vmax.f32 %v1829_v14, %v1327_v7 }
 0x5ae   :  { %v1330_v26 = vmax.f32 %v1830_v16, %v1328_v19 }
 0x5af   :  { %v1331_v27 = vrot.slane %v1329_v23, 4 }
 0x5b0   :  { %v1337_v28 = vrot.slane %v1330_v26, 4 }
 0x5b1   :  { %v1332_v29 = vadd.f32 %v1331_v27, %v1329_v23 }
 0x5b2   :  { %v1338_v30 = vadd.f32 %v1337_v28, %v1330_v26 }
 0x5b3   :  { %v1333_v31 = vrot.slane %v1332_v29, 2 }
 0x5b4   :  { %v1339_v32 = vrot.slane %v1338_v30, 2 }
 0x5b5   :  { %v1334_v63 = vadd.f32 %v1333_v31, %v1332_v29 }
 0x5b6   :  { %v1340_v22 = vadd.f32 %v1339_v32, %v1338_v30 }
 0x5b7   :  { %v1335_v33 = vrot.slane %v1334_v63, 1 }
 0x5b8   :  { %v1341_v24 = vrot.slane %v1340_v22, 1 }
 0x5b9   :  { %v1336_v34 = vadd.f32 %v1335_v33, %v1334_v63 }
 0x5ba   :  { %v1342_v35 = vadd.f32 %v1341_v24, %v1340_v22 }
 0x5bb   :  { %v1343_v36 = vmul.f32 0.125, %v1336_v34 }
 0x5bc   :  { %v1344_v2 = vmul.f32 0.125, %v1342_v35 }
 0x5bd   :  { %v1345_v5 = vsub.f32 %v1329_v23, %v1343_v36 }
 0x5be   :  { %v1346_v37 = vsub.f32 %v1330_v26, %v1344_v2 }
 0x5bf   :  { %v1347_v38 = vmul.f32 %v1345_v5, %v1345_v5 }
 0x5c0   :  { %v1348_v39 = vmul.f32 %v1346_v37, %v1346_v37 }
 0x5c1   :  { %v1349_v40 = vrot.slane %v1347_v38, 4 }
 0x5c2   :  { %v1355_v41 = vrot.slane %v1348_v39, 4 }
 0x5c3   :  { %v1350_v42 = vadd.f32 %v1349_v40, %v1347_v38 }
 0x5c4   :  { %v1356_v43 = vadd.f32 %v1355_v41, %v1348_v39 }
 0x5c5   :  { %v1351_v44 = vrot.slane %v1350_v42, 2 }
 0x5c6   :  { %v1357_v45 = vrot.slane %v1356_v43, 2 }
 0x5c7   :  { %v1352_v46 = vadd.f32 %v1351_v44, %v1350_v42 }
 0x5c8   :  { %v1358_v47 = vadd.f32 %v1357_v45, %v1356_v43 }
 0x5c9   :  { %v1353_v48 = vrot.slane %v1352_v46, 1 }
 0x5ca   :  { %v1359_v49 = vrot.slane %v1358_v47, 1 }
 0x5cb   :  { %v1354_v50 = vadd.f32 %v1353_v48, %v1352_v46 }
 0x5cc   :  { %v1360_v51 = vadd.f32 %v1359_v49, %v1358_v47 }
 0x5cd   :  { %v1361_v52 = vmul.f32 0.125, %v1354_v50 }
 0x5ce   :  { %v1362_v53 = vmul.f32 0.125, %v1360_v51 }
 0x5cf   :  { %v1363_v21 = vadd.f32 1e-05, %v1361_v52 }
 0x5d0   :  { %v1364_v25 = vadd.f32 1e-05, %v1362_v53 }
 0x5d1   :  { %1893 = vrsqrt.f32 %v1363_v21 }
 0x5d2   :  { %1895 = vrsqrt.f32 %v1364_v25 }
 0x5db   :  { %v1894_v54 = vpop.eup %1893 }
 0x5dc   :  { %v1896_v55 = vpop.eup %1895  ;;  %v1367_v56 = vmul.f32 %v1894_v54, %v1345_v5 }
 0x5dd   :  { %v1368_v57 = vmul.f32 %v1896_v55, %v1346_v37 }
 0x5de   :  { %1983 = dma.done.wait [#allocation3], 2048 }
 0x5df   :  { %1984 = vsyncadd [#allocation3], 4294965248  ;;  %v1420_v58 = vpack.c.bf16 %v1368_v57, %v1368_v57  ;;  %1498 = sst [smem:[#allocation23]] %s1993_s9  ;;  %v1410_v59 = vld [vmem:[#allocation2 + $0x100] sm:$0xff]  ;;  %v1419_v15 = vpack.c.bf16 %v1367_v56, %v1367_v56  ;;  %v1418_v16 = vld [vmem:[#allocation7 + $0x4] ss:$0 sm:$0xff] }
 0x5e0   :  { %1500 = sst [smem:[#allocation23 + $0x1]] %s1993_s9  ;;  %v1402_v60 = vld [vmem:[#allocation2] sm:$0xff]  ;;  %1743 = vmatprep.subr.bf16.mxu0 %v1410_v59 }
 0x5e1   :  { %1453 = vmatprep.mubr.bf16.mxu0 %v1420_v58  ;;  %1502 = sst [smem:[#allocation23 + $0x2]] %s1997_s2  ;;  %v1411_v61 = vld [vmem:[#allocation2 + $0x120] sm:$0xff]  ;;  %1744 = vmatpush3.bf16.msra.mxu0 %v1402_v60  ;;  %s2011_s2 = smov [#allocation22]  }
 0x5e2   :  { %1504 = sst [smem:[#allocation23 + $0x3]] %s1998_s14  ;;  %1745 = vmatprep.subr.bf16.mxu0 %v1411_v61  ;;  %v1403_v62 = vld [vmem:[#allocation2 + $0x20] sm:$0xff] }
 0x5e3   :  { %1506 = sst [smem:[#allocation23 + $0x4]] %s1995_s11  ;;  %v1412_v0 = vld [vmem:[#allocation2 + $0x140] sm:$0xff]  ;;  %s1482_s11 = scalar_lea.hbm %s2269_s1, 28864 }
 0x5e4   :  { %1508 = sst [smem:[#allocation23 + $0x5]] %s1994_s10  ;;  %v1404_v1 = vld [vmem:[#allocation2 + $0x40] sm:$0xff] }
 0x5e5   :  { %1746 = vmatpush3.bf16.msra.mxu0 %v1403_v62  ;;  %v1413_v3 = vld [vmem:[#allocation2 + $0x160] sm:$0xff] }
 0x5e6   :  { %1747 = vmatprep.subr.bf16.mxu0 %v1412_v0  ;;  %v1405_v4 = vld [vmem:[#allocation2 + $0x60] sm:$0xff] }
 0x5e7   :  { %v1414_v6 = vld [vmem:[#allocation2 + $0x180] sm:$0xff] }
 0x5e8   :  { %v1406_v8 = vld [vmem:[#allocation2 + $0x80] sm:$0xff] }
 0x5e9   :  { %1748 = vmatpush3.bf16.msra.mxu0 %v1404_v1  ;;  %v1415_v9 = vld [vmem:[#allocation2 + $0x1a0] sm:$0xff] }
 0x5ea   :  { %1749 = vmatprep.subr.bf16.mxu0 %v1413_v3  ;;  %v1407_v10 = vld [vmem:[#allocation2 + $0xa0] sm:$0xff] }
 0x5eb   :  { %v1416_v11 = vld [vmem:[#allocation2 + $0x1c0] sm:$0xff] }
 0x5ec   :  { %v1408_v12 = vld [vmem:[#allocation2 + $0xc0] sm:$0xff] }
 0x5ed   :  { %1750 = vmatpush3.bf16.msra.mxu0 %v1405_v4  ;;  %v1417_v13 = vld [vmem:[#allocation2 + $0x1e0] sm:$0xff] }
 0x5ee   :  { %1751 = vmatprep.subr.bf16.mxu0 %v1414_v6  ;;  %v1409_v14 = vld [vmem:[#allocation2 + $0xe0] sm:$0xff] }
 0x5ef   :  { %1510 = dma.general %s1482_s11, 1024, %s2070_s17, %s2000_s18, %s2011_s2, [#allocation23], %s2066_s15, 0  }
 0x5f1   :  { %1752 = vmatpush3.bf16.msra.mxu0 %v1406_v8 }
 0x5f2   :  { %1753 = vmatprep.subr.bf16.mxu0 %v1415_v9 }
 0x5f5   :  { %1754 = vmatpush3.bf16.msra.mxu0 %v1407_v10 }
 0x5f6   :  { %1755 = vmatprep.subr.bf16.mxu0 %v1416_v11 }
 0x5f9   :  { %1756 = vmatpush3.bf16.msra.mxu0 %v1408_v12 }
 0x5fa   :  { %1757 = vmatprep.subr.bf16.mxu0 %v1417_v13 }
 0x5fd   :  { %1758 = vmatpush3.bf16.msra.mxu0 %v1409_v14 }
 0x600   :  { %1454 = vmatmul.mubr.bf16.vlgmr.msra.gmra.mrb[12].mxu0 %v1419_v15 }
 0x6d3   :  { %v1759_v17 = vpop.f32.mrb[12].mxu0 }
 0x6d4   :  { %v1760_v7 = vpop.f32.mrb[13].mxu0 }
 0x6d5   :  { %v1761_v18 = vadd.f32 %v1760_v7, %v1759_v17  ;;  %v1762_v19 = vpop.f32.mrb[14].mxu0 }
 0x6d6   :  { %v1763_v23 = vpop.f32.mrb[15].mxu0 }
 0x6d7   :  { %v1456_v26 = vadd.f32 %v1761_v18, %v1418_v16 }
 0x6d9   :  { %v1461_v27 = vmul.f32 0.01, %v1456_v26 }
 0x6db   :  { %v1462_v28 = vmax.f32 %v1456_v26, %v1461_v27 }
 0x6dd   :  { %v1463_v29 = vrot.slane %v1462_v28, 4 }
 0x6df   :  { %v1464_v30 = vadd.f32 %v1463_v29, %v1462_v28 }
 0x6e1   :  { %v1465_v31 = vrot.slane %v1464_v30, 2 }
 0x6e3   :  { %v1466_v32 = vadd.f32 %v1465_v31, %v1464_v30 }
 0x6e5   :  { %v1467_v63 = vrot.slane %v1466_v32, 1 }
 0x6e7   :  { %v1468_v22 = vadd.f32 %v1467_v63, %v1466_v32 }
 0x6e9   :  { %v1469_v33 = vmul.f32 0.125, %v1468_v22 }
 0x6eb   :  { %v1470_v24 = vsub.f32 %v1462_v28, %v1469_v33 }
 0x6ed   :  { %v1471_v34 = vmul.f32 %v1470_v24, %v1470_v24 }
 0x6ef   :  { %v1472_v35 = vrot.slane %v1471_v34, 4 }
 0x6f1   :  { %v1473_v36 = vadd.f32 %v1472_v35, %v1471_v34 }
 0x6f3   :  { %v1474_v2 = vrot.slane %v1473_v36, 2 }
 0x6f5   :  { %v1475_v5 = vadd.f32 %v1474_v2, %v1473_v36 }
 0x6f7   :  { %v1476_v37 = vrot.slane %v1475_v5, 1 }
 0x6f9   :  { %v1477_v38 = vadd.f32 %v1476_v37, %v1475_v5 }
 0x6fb   :  { %v1478_v39 = vmul.f32 0.125, %v1477_v38 }
 0x6fd   :  { %v1479_v40 = vadd.f32 1e-05, %v1478_v39 }
 0x6ff   :  { %1897 = vrsqrt.f32 %v1479_v40 }
 0x709   :  { %v1898_v41 = vpop.eup %1897 }
 0x70a   :  { %v1481_v42 = vmul.f32 %v1898_v41, %v1470_v24 }
 0x70b   :  { %1985 = dma.done.wait [#allocation3 + $0x1], 1024 }
 0x70c   :  { %1986 = vsyncadd [#allocation3 + $0x1], 4294966272  ;;  %v2012_v43 = vmov 0.0   ;;  %vm2013_vm1 = vmmov 0   ;;  %v1515_v44 = vld [vmem:[#allocation2 + $0x400] sm:$0xff]  ;;  %v1524_v52 = vpack.c.bf16 %v1481_v42, %v1481_v42 }
 0x70d   :  { %1783 = vmatprep.subr.bf16.mxu0 %v2012_v43  ;;  %1799 = vmatprep.mubr.msk.bf16.mxu0 %vm2013_vm1, %v2012_v43  ;;  %v1516_v45 = vld [vmem:[#allocation2 + $0x420] sm:$0xff]  ;;  %v1523_v53 = vld [vmem:[#allocation7 + $0x5] ss:$0 sm:$0xff] }
 0x70e   :  { %1784 = vmatpush3.bf16.msra.mxu0 %v1515_v44  ;;  %v1517_v46 = vld [vmem:[#allocation2 + $0x440] sm:$0xff] }
 0x70f   :  { %1785 = vmatprep.subr.bf16.mxu0 %v2012_v43  ;;  %v1518_v47 = vld [vmem:[#allocation2 + $0x460] sm:$0xff] }
 0x710   :  { %v1519_v48 = vld [vmem:[#allocation2 + $0x480] sm:$0xff] }
 0x711   :  { %v1520_v49 = vld [vmem:[#allocation2 + $0x4a0] sm:$0xff] }
 0x712   :  { %1786 = vmatpush3.bf16.msra.mxu0 %v1516_v45  ;;  %v1521_v50 = vld [vmem:[#allocation2 + $0x4c0] sm:$0xff] }
 0x713   :  { %1787 = vmatprep.subr.bf16.mxu0 %v2012_v43  ;;  %v1522_v51 = vld [vmem:[#allocation2 + $0x4e0] sm:$0xff] }
 0x716   :  { %1788 = vmatpush3.bf16.msra.mxu0 %v1517_v46 }
 0x717   :  { %1789 = vmatprep.subr.bf16.mxu0 %v2012_v43 }
 0x71a   :  { %1790 = vmatpush3.bf16.msra.mxu0 %v1518_v47 }
 0x71b   :  { %1791 = vmatprep.subr.bf16.mxu0 %v2012_v43 }
 0x71e   :  { %1792 = vmatpush3.bf16.msra.mxu0 %v1519_v48 }
 0x71f   :  { %1793 = vmatprep.subr.bf16.mxu0 %v2012_v43 }
 0x722   :  { %1794 = vmatpush3.bf16.msra.mxu0 %v1520_v49 }
 0x723   :  { %1795 = vmatprep.subr.bf16.mxu0 %v2012_v43 }
 0x726   :  { %1796 = vmatpush3.bf16.msra.mxu0 %v1521_v50 }
 0x727   :  { %1797 = vmatprep.subr.bf16.mxu0 %v2012_v43 }
 0x72a   :  { %1798 = vmatpush3.bf16.msra.mxu0 %v1522_v51 }
 0x72d   :  { %1800 = vmatmul.mubr.bf16.vlgmr.msra.gmra.mrb[16].mxu0 %v1524_v52 }
 0x800   :  { %v1559_v21 = vpop.f32.mrb[16].mxu0 }
 0x801   :  { %v1560_v25 = vadd.f32 %v1559_v21, %v1523_v53  ;;  %v1801_v54 = vpop.f32.mrb[17].mxu0 }
 0x802   :  { %v1562_v55 = vpop.f32.mrb[18].mxu0 }
 0x803   :  { %v1565_v56 = vmul.f32 0.01, %v1560_v25  ;;  %v1802_v57 = vpop.f32.mrb[19].mxu0 }
 0x805   :  { %v1566_v58 = vmax.f32 %v1560_v25, %v1565_v56 }
 0x807   :  { %v1567_v59 = vrot.slane %v1566_v58, 4 }
 0x809   :  { %v1568_v60 = vadd.f32 %v1567_v59, %v1566_v58 }
 0x80b   :  { %v1569_v61 = vrot.slane %v1568_v60, 2 }
 0x80d   :  { %v1570_v62 = vadd.f32 %v1569_v61, %v1568_v60 }
 0x80f   :  { %v1571_v0 = vrot.slane %v1570_v62, 1 }
 0x811   :  { %v1572_v1 = vadd.f32 %v1571_v0, %v1570_v62 }
 0x813   :  { %v1573_v3 = vmul.f32 0.125, %v1572_v1 }
 0x815   :  { %v1574_v4 = vsub.f32 %v1566_v58, %v1573_v3 }
 0x817   :  { %v1575_v6 = vmul.f32 %v1574_v4, %v1574_v4 }
 0x819   :  { %v1576_v8 = vrot.slane %v1575_v6, 4 }
 0x81b   :  { %v1577_v9 = vadd.f32 %v1576_v8, %v1575_v6 }
 0x81d   :  { %v1578_v10 = vrot.slane %v1577_v9, 2 }
 0x81f   :  { %v1579_v11 = vadd.f32 %v1578_v10, %v1577_v9 }
 0x821   :  { %v1580_v12 = vrot.slane %v1579_v11, 1 }
 0x823   :  { %v1581_v13 = vadd.f32 %v1580_v12, %v1579_v11 }
 0x825   :  { %v1582_v14 = vmul.f32 0.125, %v1581_v13 }
 0x827   :  { %v1583_v15 = vadd.f32 1e-05, %v1582_v14 }
 0x829   :  { %1899 = vrsqrt.f32 %v1583_v15 }
 0x833   :  { %v1900_v16 = vpop.eup %1899 }
 0x834   :  { %v1585_v17 = vmul.f32 %v1900_v16, %v1574_v4 }
 0x835   :  { %1987 = dma.done.wait [#allocation3], 1024 }
 0x836   :  { %1988 = vsyncadd [#allocation3], 4294966272  ;;  %1803 = vmatprep.subr.bf16.mxu1 %v2012_v43  ;;  %1819 = vmatprep.mubr.msk.bf16.mxu1 %vm2013_vm1, %v2012_v43  ;;  %v1588_v7 = vld [vmem:[#allocation2] sm:$0xff]  ;;  %v1597_v30 = vpack.c.bf16 %v1585_v17, %v1585_v17  ;;  %v1639_v31 = vand.u32 127, %v134_v20  ;;  %v1596_v32 = vld [vmem:[#allocation7 + $0x6] ss:$0 sm:$0xff] }
 0x837   :  { %1804 = vmatpush3.bf16.msra.mxu1 %v1588_v7  ;;  %v1589_v18 = vld [vmem:[#allocation2 + $0x20] sm:$0xff]  ;;  %s2014_s1 = smov [#allocation9]  }
 0x838   :  { %1805 = vmatprep.subr.bf16.mxu1 %v2012_v43  ;;  %v1590_v19 = vld [vmem:[#allocation2 + $0x40] sm:$0xff]  ;;  %vm1640_vm2 = vcmp.lt.s32.totalorder %v1639_v31, 10  ;;  %s1658_s14 = sshll.u32 %s2014_s1, 4  ;;  %s1659_s14 = int_to_ptr.vmem [resolvable:$true] %s1658_s14 }
 0x839   :  { %v1591_v23 = vld [vmem:[#allocation2 + $0x60] sm:$0xff]  ;;  %s1949_s15 = scalar_lea.vmem %s1659_s14, 128  ;;  %p1954_p3 = scmp.lt.s32.totalorder %s1659_s14, %s1659_s14 }
 0x83a   :  { %v1592_v26 = vld [vmem:[#allocation2 + $0x80] sm:$0xff]  ;;  %p1950_p2 = scmp.ne.s32.totalorder %s1659_s14, %s1949_s15  ;;  %p1955_p4 = scmp.lt.s32.totalorder %s1949_s15, %s1949_s15 }
 0x83b   :  { %1806 = vmatpush3.bf16.msra.mxu1 %v1589_v18  ;;  %v1593_v27 = vld [vmem:[#allocation2 + $0xa0] sm:$0xff] }
 0x83c   :  { %1807 = vmatprep.subr.bf16.mxu1 %v2012_v43  ;;  %v1594_v28 = vld [vmem:[#allocation2 + $0xc0] sm:$0xff]  ;;  %p1956_p5 = por %p1955_p4, %p1954_p3 }
 0x83d   :  { %v1595_v29 = vld [vmem:[#allocation2 + $0xe0] sm:$0xff] }
 0x83e   :  { %p1957_p6 = pnand %p1956_p5, %p1950_p2 }
 0x83f   :  { %1808 = vmatpush3.bf16.msra.mxu1 %v1590_v19 }
 0x840   :  { %1809 = vmatprep.subr.bf16.mxu1 %v2012_v43 }
 0x843   :  { %1810 = vmatpush3.bf16.msra.mxu1 %v1591_v23 }
 0x844   :  { %1811 = vmatprep.subr.bf16.mxu1 %v2012_v43 }
 0x847   :  { %1812 = vmatpush3.bf16.msra.mxu1 %v1592_v26 }
 0x848   :  { %1813 = vmatprep.subr.bf16.mxu1 %v2012_v43 }
 0x84b   :  { %1814 = vmatpush3.bf16.msra.mxu1 %v1593_v27 }
 0x84c   :  { %1815 = vmatprep.subr.bf16.mxu1 %v2012_v43 }
 0x84f   :  { %1816 = vmatpush3.bf16.msra.mxu1 %v1594_v28 }
 0x850   :  { %1817 = vmatprep.subr.bf16.mxu1 %v2012_v43 }
 0x853   :  { %1818 = vmatpush3.bf16.msra.mxu1 %v1595_v29 }
 0x856   :  { %1820 = vmatmul.mubr.bf16.vlgmr.msra.gmra.mrb[20].mxu1 %v1597_v30 }
 0x929   :  { %v1632_v63 = vpop.f32.mrb[20].mxu1 }
 0x92a   :  { %v1633_v22 = vadd.f32 %v1632_v63, %v1596_v32  ;;  %v1821_v33 = vpop.f32.mrb[21].mxu1 }
 0x92b   :  { %v1635_v24 = vpop.f32.mrb[22].mxu1 }
 0x92c   :  { %v1822_v34 = vpop.f32.mrb[23].mxu1  ;;  %v1641_v35 = vsel %vm1640_vm2, %v1633_v22, -1e+30 }
 0x92d   :  { %1642 = vmax.xlane.f32.xlu0 %v1641_v35 }
 0x9ba   :  { %v1643_v36 = vpop.xlane.xlu0 %1642 }
 0x9bb   :  { %v1644_v2 = vsub.f32 %v1641_v35, %v1643_v36 }
 0x9bd   :  { %v1645_v5 = vmul.f32 1.442695, %v1644_v2 }
 0x9bf   :  { %1901 = vpow2.f32 %v1645_v5 }
 0x9c9   :  { %v1902_v37 = vpop.eup %1901 }
 0x9ca   :  { %1647 = vadd.xlane.f32.xlu0 %v1902_v37 }
 0xa57   :  { %v1648_v38 = vpop.xlane.xlu0 %1647 }
 0xa58   :  { %1903 = vrcp.f32 %v1648_v38 }
 0xa62   :  { %v1904_v20 = vpop.eup %1903 }
 0xa63   :  { %v1650_v39 = vmul.f32 %v1904_v20, %v1902_v37 }
 0xa65   :  { %1651 = vst [vmem:[#allocation9] sm:$0xff] %v1650_v39 }
 0xa66   :  { %1960 = shalt.err (!%p1957_p6)
}
 0xa67   :  { %s1961_s23 = scalar_lea.hbm %s2271_s3, 128 }
 0xa68   :  { %p1962_p7 = scmp.ne.s32.totalorder %s2271_s3, %s1961_s23  ;;  %p1965_p8 = scmp.lt.u32.totalorder %s1961_s23, %s2271_s3 }
 0xa6a   :  { %p1967_p9 = pnand %p1965_p8, %p1962_p7 }
 0xa6c   :  { %1970 = shalt.err (!%p1967_p9)
}
 0xa6d   :  { %1661 = dma.vmem_to_hbm [thread:$0]  %s1659_s14, 128, %s2271_s3, [#allocation6]  }
 0xa6e   :  { %1989 = dma.done.wait [#allocation6], 128  }
 0xa6f   :  { %1990 = vsyncadd [#allocation6], 4294967168 }
 0xa70   :  { %1665 = vsyncpa [#allocation5], 1 }
 0xa71   :  { %1666 = vsyncpa [#allocation8], 1 }
 0xa72   :  { %1667 = vsyncpa [#allocation6], 1 }
 0xa73   :  { %1668 = vsyncmov [#allocation3] }
 0xa76   :  { %s1669_s5 = vpop.sfrf %1668 }
 0xa77   :  { %p1697_p10 = scmp.ne.s32.totalorder %s1669_s5, 0 }
 0xa79   :  { %1673 = shalt.err (%p1697_p10)  }
 0xa7a   :  { %1675 = vsyncmov [#allocation3 + $0x1] }
 0xa7d   :  { %s1676_s6 = vpop.sfrf %1675 }
 0xa7e   :  { %p1698_p11 = scmp.ne.s32.totalorder %s1676_s6, 0 }
 0xa80   :  { %1680 = shalt.err (%p1698_p11)  }

</bundles_post_ra>
